<compile_context>
chip_gen: v5e
topology: v5e:2x2
jax: 0.10.0
libtpu: 0.0.40
codegen_flags: <defaults>
</compile_context>

<pallas_src>
import functools

import jax
import jax.numpy as jnp
from jax.experimental import pallas as pl
from jax.experimental.pallas import tpu as pltpu


# -----------------------------------------------------------------------------
# device / tile helpers
# -----------------------------------------------------------------------------
_VREG_FILE_BYTES = 256 * 1024          # 64 vregs x 4 KiB
_LANE_TILE_CANDIDATES = (8192, 4096, 2048, 1024, 512, 256, 128)
_MODE_TILE_CANDIDATES = (4096, 2048, 1024, 512, 256, 128)


@functools.lru_cache(maxsize=None)
def _vmem_capacity_bytes():
    """Physical VMEM per TensorCore; conservative fallback if query fails."""
    try:
        cap = int(getattr(pltpu.get_tpu_info(), "vmem_capacity_bytes"))
        if cap > 0:
            return cap
    except Exception:
        pass
    return 64 * 1024 * 1024            # v7x-sized fallback: safe on all gens


def _vmem_budget_bytes():
    # working-set budget used for tile selection (leave pipeline/scratch room)
    return int(_vmem_capacity_bytes() * 0.60)


def _vmem_limit_bytes():
    # scoped-VMEM limit handed to Mosaic (raises v5e/v6e 16/32 MiB defaults)
    return int(_vmem_capacity_bytes() * 0.85)


def _pick_lane_tile(n, cap=None):
    """Largest lane tile (multiple of 128) that divides n, optionally capped."""
    cap = None if cap is None else max(int(cap), 128)
    for t in _LANE_TILE_CANDIDATES:
        if cap is not None and t > cap:
            continue
        if n % t == 0:
            return t
    # fallback: full extent (valid: block dim equal to the full array dim)
    return n


def _pick_mode_tile(m, cin, cout):
    """Largest mode tile that fits both the device VMEM budget (double-buffered
    2 weight blocks + 2 x blocks + 2 out blocks) and a vreg-pressure bound
    (live acc_r/acc_i/xr/xi <= half the register file)."""
    budget = _vmem_budget_bytes()
    for t in _MODE_TILE_CANDIDATES:
        if m % t != 0:
            continue
        vmem_ws = 2 * 4 * t * (2 * cin * cout + 2 * cin + 2 * cout)
        vreg_ws = 4 * t * (2 * cout + 2 * cin)
        if vmem_ws <= budget and vreg_ws <= _VREG_FILE_BYTES // 2:
            return t
    return 128                          # m is padded to a multiple of 128


# -----------------------------------------------------------------------------
# Pallas kernels (channels-first: spatial / mode dim in lanes)
# -----------------------------------------------------------------------------
def _cf_linear_kernel(x_ref, w_ref, b_ref, o_ref, *, act):
    # x: (1, Cin, TN), w: (Cout, Cin), b: (Cout, 1) -> o: (1, Cout, TN)
    y = jnp.dot(w_ref[...], x_ref[0], preferred_element_type=jnp.float32)
    y = y + b_ref[...]
    if act == "tanh":
        y = jnp.tanh(y)
    elif act == "relu":
        y = jnp.maximum(y, 0.0)
    o_ref[0] = y.astype(o_ref.dtype)


def _cf_linear_res_kernel(x_ref, w_ref, b_ref, r_ref, o_ref, *, act):
    # fused 1x1-conv + residual add (+ tanh): o = act(w @ x + b + r)
    y = jnp.dot(w_ref[...], x_ref[0], preferred_element_type=jnp.float32)
    y = y + b_ref[...] + r_ref[0]
    if act == "tanh":
        y = jnp.tanh(y)
    elif act == "relu":
        y = jnp.maximum(y, 0.0)
    o_ref[0] = y.astype(o_ref.dtype)


def _mlp_head_kernel(x_ref, w1_ref, b1_ref, w2_ref, b2_ref, o_ref):
    # fused fc1 + tanh + fc2 (both tiny weight matrices live in VMEM)
    h = jnp.dot(w1_ref[...], x_ref[0], preferred_element_type=jnp.float32)
    h = jnp.tanh(h + b1_ref[...])
    y = jnp.dot(w2_ref[...], h, preferred_element_type=jnp.float32)
    o_ref[0] = (y + b2_ref[...]).astype(o_ref.dtype)


def _spec_mul_kernel(xr_ref, xi_ref, wr_ref, wi_ref, or_ref, oi_ref):
    # Per-mode complex channel contraction, Cin-accumulated, plain 4-multiply
    # complex product (only wr / wi shipped -> 1/3 less weight DMA):
    #   out_r += wr*xr - wi*xi ;  out_i += wr*xi + wi*xr
    cin = xr_ref.shape[1]
    xr = xr_ref[0]                       # (Cin, Mt)
    xi = xi_ref[0]

    wr0 = wr_ref[0, 0]                   # (Cout, Mt)
    wi0 = wi_ref[0, 0]
    acc_r = wr0 * xr[0:1, :] - wi0 * xi[0:1, :]
    acc_i = wr0 * xi[0:1, :] + wi0 * xr[0:1, :]
    for i in range(1, cin):              # static unroll over Cin
        wri = wr_ref[0, i]
        wii = wi_ref[0, i]
        acc_r = acc_r + wri * xr[i:i + 1, :] - wii * xi[i:i + 1, :]
        acc_i = acc_i + wri * xi[i:i + 1, :] + wii * xr[i:i + 1, :]

    or_ref[0] = acc_r
    oi_ref[0] = acc_i


# -----------------------------------------------------------------------------
# Pallas wrappers
# -----------------------------------------------------------------------------
def pallas_cf_linear(x, wt, b, residual=None, act="none"):
    """Channels-first pointwise linear: out[b,:,n] = act(wt @ x[b,:,n] + b [+ r]).

    x: (B, Cin, N), wt: (Cout, Cin), b: (Cout,), residual: (B, Cout, N)."""
    bsz, cin, n = x.shape
    cout = wt.shape[0]
    tn = _pick_lane_tile(n)
    grid = (bsz, pl.cdiv(n, tn))
    b2 = b.reshape(cout, 1)

    x_spec = pl.BlockSpec((1, cin, tn), lambda bi, ni: (bi, 0, ni))
    w_spec = pl.BlockSpec((cout, cin), lambda bi, ni: (0, 0))
    b_spec = pl.BlockSpec((cout, 1), lambda bi, ni: (0, 0))
    o_spec = pl.BlockSpec((1, cout, tn), lambda bi, ni: (bi, 0, ni))
    out_shape = jax.ShapeDtypeStruct((bsz, cout, n), x.dtype)
    cp = pltpu.CompilerParams(
        dimension_semantics=("parallel", "parallel"),
        vmem_limit_bytes=_vmem_limit_bytes())

    if residual is None:
        return pl.pallas_call(
            functools.partial(_cf_linear_kernel, act=act),
            out_shape=out_shape, grid=grid,
            in_specs=[x_spec, w_spec, b_spec], out_specs=o_spec,
            compiler_params=cp,
        )(x, wt, b2)

    r_spec = pl.BlockSpec((1, cout, tn), lambda bi, ni: (bi, 0, ni))
    return pl.pallas_call(
        functools.partial(_cf_linear_res_kernel, act=act),
        out_shape=out_shape, grid=grid,
        in_specs=[x_spec, w_spec, b_spec, r_spec], out_specs=o_spec,
        compiler_params=cp,
    )(x, wt, b2, residual)


def pallas_mlp_head(x, w1t, b1, w2t, b2):
    """Fused fc1 + tanh + fc2, channels-first.  x: (B, Cin, N) -> (B, Cout, N)."""
    bsz, cin, n = x.shape
    fc = w1t.shape[0]
    cout = w2t.shape[0]
    # fc_dim-aware cap: keep the live (fc, tn) f32 intermediate <= ~128 KB.
    tn = _pick_lane_tile(n, cap=(_VREG_FILE_BYTES // 2) // (4 * fc))
    grid = (bsz, pl.cdiv(n, tn))

    x_spec = pl.BlockSpec((1, cin, tn), lambda bi, ni: (bi, 0, ni))
    w1_spec = pl.BlockSpec((fc, cin), lambda bi, ni: (0, 0))
    b1_spec = pl.BlockSpec((fc, 1), lambda bi, ni: (0, 0))
    w2_spec = pl.BlockSpec((cout, fc), lambda bi, ni: (0, 0))
    b2_spec = pl.BlockSpec((cout, 1), lambda bi, ni: (0, 0))
    o_spec = pl.BlockSpec((1, cout, tn), lambda bi, ni: (bi, 0, ni))

    return pl.pallas_call(
        _mlp_head_kernel,
        out_shape=jax.ShapeDtypeStruct((bsz, cout, n), x.dtype),
        grid=grid,
        in_specs=[x_spec, w1_spec, b1_spec, w2_spec, b2_spec],
        out_specs=o_spec,
        compiler_params=pltpu.CompilerParams(
            dimension_semantics=("parallel", "parallel"),
            vmem_limit_bytes=_vmem_limit_bytes()),
    )(x, w1t, b1.reshape(fc, 1), w2t, b2.reshape(cout, 1))


def pallas_spectral_mul(xr, xi, wr_p, wi_p):
    """xr, xi: (B, Cin, Mp); wr_p/wi_p tile-major: (Mp//mt, Cin, Cout, mt).
    Returns real/imag of the per-mode channel contraction, (B, Cout, Mp)."""
    bsz, cin, m_pad = xr.shape
    n_tiles, _, cout, mt = wr_p.shape
    assert n_tiles * mt == m_pad, (n_tiles, mt, m_pad)
    # batch is the inner grid axis -> weight tile index is unchanged across
    # consecutive steps (no weight re-DMA per batch); mode axis is "parallel"
    # so v7x megacore shards modes, not batch (no duplicated weight traffic).
    grid = (n_tiles, bsz)

    x_spec = pl.BlockSpec((1, cin, mt), lambda mi, bi: (bi, 0, mi))
    w_spec = pl.BlockSpec((1, cin, cout, mt), lambda mi, bi: (mi, 0, 0, 0))
    o_spec = pl.BlockSpec((1, cout, mt), lambda mi, bi: (bi, 0, mi))
    out_shape = (
        jax.ShapeDtypeStruct((bsz, cout, m_pad), xr.dtype),
        jax.ShapeDtypeStruct((bsz, cout, m_pad), xr.dtype),
    )
    return pl.pallas_call(
        _spec_mul_kernel,
        out_shape=out_shape,
        grid=grid,
        in_specs=[x_spec, x_spec, w_spec, w_spec],
        out_specs=[o_spec, o_spec],
        compiler_params=pltpu.CompilerParams(
            dimension_semantics=("parallel", "arbitrary"),
            vmem_limit_bytes=_vmem_limit_bytes()),
    )(xr, xi, wr_p, wi_p)


# -----------------------------------------------------------------------------
# Spectral weight packing (done ONCE at init; no per-forward prep pass)
# -----------------------------------------------------------------------------
def _spectral_geometry(cin, cout, m1, m2, m3):
    m_tot = (2 * m1) * (2 * m2) * m3
    m_pad = ((m_tot + 127) // 128) * 128      # lane-dense padded mode axis
    mt = _pick_mode_tile(m_pad, cin, cout)
    return m_tot, m_pad, mt


def pack_spectral_weight(w, m1, m2, m3):
    """w: (Cin, Cout, 2*m1, 2*m2, m3) real tensor (corner layout:
    [:m1,:m2]=w1, [m1:,:m2]=w2, [:m1,m2:]=w3, [m1:,m2:]=w4).
    Returns tile-major (Mp//mt, Cin, Cout, mt) for contiguous per-tile DMA."""
    cin, cout = w.shape[0], w.shape[1]
    m_tot, m_pad, mt = _spectral_geometry(cin, cout, m1, m2, m3)
    wf = w.reshape(cin, cout, m_tot)
    if m_pad != m_tot:
        wf = jnp.pad(wf, ((0, 0), (0, 0), (0, m_pad - m_tot)))
    return wf.reshape(cin, cout, m_pad // mt, mt).transpose(2, 0, 1, 3)


# -----------------------------------------------------------------------------
# SpectralConv3d (FFT glue in plain JAX, mode mixing in Pallas)
# -----------------------------------------------------------------------------
def spectral_conv3d(x, wr_p, wi_p, m1, m2, m3):
    """x: (B, Cin, X, Y, Z) real; wr_p/wi_p: tile-major packed spectral weights."""
    b, cin, sx, sy, sz = x.shape
    n_tiles, _, cout, mt = wr_p.shape
    m_pad = n_tiles * mt
    m_tot = (2 * m1) * (2 * m2) * m3
    assert 2 * m1 <= sx and 2 * m2 <= sy and m3 <= sz // 2 + 1, (m1, m2, m3, sx, sy, sz)

    # TODO(synk): FFT has no Pallas primitive; rfftn/irfftn stay in plain JAX.
    x_ft = jnp.fft.rfftn(x, axes=(-3, -2, -1))        # (B, Cin, X, Y, Z//2+1)
    # Gather low/high corner blocks into a (2*m1, 2*m2, m3) mode cube with two
    # concatenations of contiguous slices (no 4-way stack).
    xc = jnp.concatenate([x_ft[:, :, :m1], x_ft[:, :, sx - m1:]], axis=2)
    xc = jnp.concatenate([xc[:, :, :, :m2], xc[:, :, :, sy - m2:]], axis=3)
    xc = xc[..., :m3]                                  # (B, Cin, 2m1, 2m2, m3)

    xr = jnp.real(xc).reshape(b, cin, m_tot)
    xi = jnp.imag(xc).reshape(b, cin, m_tot)
    if m_pad != m_tot:
        pad = ((0, 0), (0, 0), (0, m_pad - m_tot))
        xr, xi = jnp.pad(xr, pad), jnp.pad(xi, pad)

    our, oui = pallas_spectral_mul(xr, xi, wr_p, wi_p)
    out = (our[:, :, :m_tot] + 1j * oui[:, :, :m_tot]).astype(jnp.complex64)
    out = out.reshape(b, cout, 2 * m1, 2 * m2, m3)

    zf = sz // 2 + 1
    out_ft = jnp.zeros((b, cout, sx, sy, zf), jnp.complex64)
    out_ft = out_ft.at[:, :, :m1, :m2, :m3].set(out[:, :, :m1, :m2])
    out_ft = out_ft.at[:, :, sx - m1:, :m2, :m3].set(out[:, :, m1:, :m2])
    out_ft = out_ft.at[:, :, :m1, sy - m2:, :m3].set(out[:, :, :m1, m2:])
    out_ft = out_ft.at[:, :, sx - m1:, sy - m2:, :m3].set(out[:, :, m1:, m2:])
    return jnp.fft.irfftn(out_ft, s=(sx, sy, sz), axes=(-3, -2, -1))


# -----------------------------------------------------------------------------
# FNN3d forward (channels-first activations throughout the spectral stack)
# -----------------------------------------------------------------------------
def fnn3d_forward(params, x, modes1, modes2, modes3, layers, out_dim):
    b, sx, sy, sz, in_dim = x.shape
    n = sx * sy * sz

    # Single small layout change at the boundary: (B, X, Y, Z, Cin) -> (B, Cin, N).
    x_cf = x.reshape(b, n, in_dim).transpose(0, 2, 1)

    # fc0 (pointwise linear, channels-first)
    h = pallas_cf_linear(x_cf, params["fc0_wt"], params["fc0_b"])      # (B, C0, N)

    n_layers = len(layers) - 1
    for i in range(n_layers):
        cin, cout = layers[i], layers[i + 1]
        x1 = spectral_conv3d(
            h.reshape(b, cin, sx, sy, sz),
            params[f"sp{i}_wr"], params[f"sp{i}_wi"],
            modes1[i], modes2[i], modes3[i],
        )
        act = "tanh" if i != n_layers - 1 else "none"
        # Conv1d(kernel=1) == pointwise linear; fused with residual add + tanh.
        h = pallas_cf_linear(
            h, params[f"w{i}_wt"], params[f"w{i}_b"],
            residual=x1.reshape(b, cout, n), act=act,
        )                                                              # (B, Cout, N)

    # fused fc1 + tanh + fc2
    out_cf = pallas_mlp_head(
        h, params["fc1_wt"], params["fc1_b"], params["fc2_wt"], params["fc2_b"]
    )                                                                  # (B, out_dim, N)

    return out_cf.transpose(0, 2, 1).reshape(b, sx, sy, sz, out_dim)


# -----------------------------------------------------------------------------
# Deterministic parameter init (shapes per FNN3d.__init__; synthetic weights).
# Linear/conv weights are stored pre-transposed as (Cout, Cin); spectral
# weights are stored pre-packed tile-major.
# -----------------------------------------------------------------------------
def init_params(key, in_dim, out_dim, layers, fc_dim, modes1, modes2, modes3):
    keys = iter(jax.random.split(key, 64))
    params = {}

    def linear_t(cin, cout):
        bound = float(1.0 / (cin ** 0.5))
        wt = jax.random.uniform(next(keys), (cout, cin), jnp.float32, -bound, bound)
        bb = jax.random.uniform(next(keys), (cout,), jnp.float32, -bound, bound)
        return wt, bb

    params["fc0_wt"], params["fc0_b"] = linear_t(in_dim, layers[0])
    for i in range(len(layers) - 1):
        cin, cout = layers[i], layers[i + 1]
        scale = 1.0 / (cin * cout)
        # (Cin, Cout, 2*m1, 2*m2, m3): the 4 corner weight blocks of the
        # original module laid out as low/high halves along x and y.
        shp = (cin, cout, 2 * modes1[i], 2 * modes2[i], modes3[i])
        wr = scale * jax.random.uniform(next(keys), shp, jnp.float32)
        wi = scale * jax.random.uniform(next(keys), shp, jnp.float32)
        params[f"sp{i}_wr"] = pack_spectral_weight(wr, modes1[i], modes2[i], modes3[i])
        params[f"sp{i}_wi"] = pack_spectral_weight(wi, modes1[i], modes2[i], modes3[i])
        params[f"w{i}_wt"], params[f"w{i}_b"] = linear_t(cin, cout)
    params["fc1_wt"], params["fc1_b"] = linear_t(layers[-1], fc_dim)
    params["fc2_wt"], params["fc2_b"] = linear_t(fc_dim, out_dim)
    return params


if __name__ == "__main__":
    key = jax.random.PRNGKey(0)
    k_x, k_p = jax.random.split(key)

    # Small config consistent with FNN3d(modes1, modes2, modes3, layers=..., ...)
    B, SX, SY, SZ = 2, 8, 8, 8
    in_dim, out_dim = 3, 3
    layers = [8, 8, 8, 8]          # 3 spectral layers
    fc_dim = 32
    modes1 = [4, 4, 4]
    modes2 = [4, 4, 4]
    modes3 = [3, 3, 3]

    x = jax.random.normal(k_x, (B, SX, SY, SZ, in_dim), jnp.float32)
    params = init_params(k_p, in_dim, out_dim, layers, fc_dim, modes1, modes2, modes3)

    fwd = jax.jit(
        lambda p, xx: fnn3d_forward(p, xx, modes1, modes2, modes3, layers, out_dim)
    )
    y = jax.block_until_ready(fwd(params, x))

    assert y.shape == (B, SX, SY, SZ, out_dim), y.shape
    assert y.dtype == jnp.float32
    assert bool(jnp.all(jnp.isfinite(y)))
    print("KERNEL_OK")
</pallas_src>

<mosaic_0001>
module attributes {stable_mosaic.version = 11 : i64} {
  func.func @_cf_linear_kernel(%arg0: i32, %arg1: i32, %arg2: memref<1x3x512xf32, #tpu.memory_space<vmem>>, %arg3: memref<8x3xf32, #tpu.memory_space<vmem>>, %arg4: memref<8x1xf32, #tpu.memory_space<vmem>>, %arg5: memref<1x8x512xf32, #tpu.memory_space<vmem>>) attributes {dimension_semantics = [#tpu.dimension_semantics<parallel>, #tpu.dimension_semantics<parallel>], iteration_bounds = array<i64: 2, 1>, scalar_prefetch = 0 : i64, scratch_operands = 0 : i64, tpu.core_type = #tpu.core_type<tc>, window_params = [{transform_indices = @transform_0, window_bounds = array<i64: 1, 3, 512>}, {pipeline_mode = #tpu.pipeline_mode<synchronous>, transform_indices = @transform_1, window_bounds = array<i64: 8, 3>}, {pipeline_mode = #tpu.pipeline_mode<synchronous>, transform_indices = @transform_2, window_bounds = array<i64: 8, 1>}, {transform_indices = @transform_3, window_bounds = array<i64: 1, 8, 512>}]} {
    %c0 = arith.constant 0 : index
    %c0_0 = arith.constant 0 : index
    %0 = vector.load %arg3[%c0, %c0_0] : memref<8x3xf32, #tpu.memory_space<vmem>>, vector<8x3xf32>
    %c0_1 = arith.constant 0 : index
    %c0_2 = arith.constant 0 : index
    %c0_3 = arith.constant 0 : index
    %1 = vector.load %arg2[%c0_1, %c0_2, %c0_3] : memref<1x3x512xf32, #tpu.memory_space<vmem>>, vector<1x3x512xf32>
    %2 = vector.shape_cast %1 : vector<1x3x512xf32> to vector<3x512xf32>
    %cst = arith.constant dense<0.000000e+00> : vector<8x512xf32>
    %3 = tpu.matmul %0, %2, %cst {dimension_numbers = #tpu.dot_dimension_numbers<[1], [0], [0], [1], [0, 0, 1, 1], [], []>} : vector<8x3xf32>, vector<3x512xf32>, vector<8x512xf32> -> vector<8x512xf32>
    %c0_4 = arith.constant 0 : index
    %c0_5 = arith.constant 0 : index
    %4 = vector.load %arg4[%c0_4, %c0_5] : memref<8x1xf32, #tpu.memory_space<vmem>>, vector<8x1xf32>
    %5 = vector.broadcast %4 : vector<8x1xf32> to vector<8x512xf32>
    %6 = arith.addf %3, %5 : vector<8x512xf32>
    %c0_6 = arith.constant 0 : index
    %c0_7 = arith.constant 0 : index
    %c0_8 = arith.constant 0 : index
    %7 = vector.load %arg5[%c0_6, %c0_7, %c0_8] : memref<1x8x512xf32, #tpu.memory_space<vmem>>, vector<1x8x512xf32>
    %8 = vector.shape_cast %7 : vector<1x8x512xf32> to vector<8x512xf32>
    %9 = vector.shape_cast %6 : vector<8x512xf32> to vector<1x8x512xf32>
    tpu.vector_store %arg5[%c0_6, %c0_7, %c0_8], %9 {strides = array<i32>} : memref<1x8x512xf32, #tpu.memory_space<vmem>>, vector<1x8x512xf32>,
    return
  }
  func.func @transform_0(%arg0: i32, %arg1: i32) -> (i32, i32, i32) {
    %c0_i32 = arith.constant 0 : i32
    %c0_i32_0 = arith.constant 0 : i32
    return %arg0, %c0_i32, %arg1 : i32, i32, i32
  }
  func.func @transform_1(%arg0: i32, %arg1: i32) -> (i32, i32) {
    %c0_i32 = arith.constant 0 : i32
    %c0_i32_0 = arith.constant 0 : i32
    %c0_i32_1 = arith.constant 0 : i32
    return %c0_i32, %c0_i32_0 : i32, i32
  }
  func.func @transform_2(%arg0: i32, %arg1: i32) -> (i32, i32) {
    %c0_i32 = arith.constant 0 : i32
    %c0_i32_0 = arith.constant 0 : i32
    %c0_i32_1 = arith.constant 0 : i32
    return %c0_i32, %c0_i32_0 : i32, i32
  }
  func.func @transform_3(%arg0: i32, %arg1: i32) -> (i32, i32, i32) {
    %c0_i32 = arith.constant 0 : i32
    %c0_i32_0 = arith.constant 0 : i32
    return %arg0, %c0_i32, %arg1 : i32, i32, i32
  }
}

module attributes {stable_mosaic.version = 11 : i64} {
  func.func @_spec_mul_kernel(%arg0: i32, %arg1: i32, %arg2: memref<1x8x256xf32, #tpu.memory_space<vmem>>, %arg3: memref<1x8x256xf32, #tpu.memory_space<vmem>>, %arg4: memref<1x8x8x256xf32, #tpu.memory_space<vmem>>, %arg5: memref<1x8x8x256xf32, #tpu.memory_space<vmem>>, %arg6: memref<1x8x256xf32, #tpu.memory_space<vmem>>, %arg7: memref<1x8x256xf32, #tpu.memory_space<vmem>>) attributes {dimension_semantics = [#tpu.dimension_semantics<parallel>, #tpu.dimension_semantics<arbitrary>], iteration_bounds = array<i64: 1, 2>, scalar_prefetch = 0 : i64, scratch_operands = 0 : i64, tpu.core_type = #tpu.core_type<tc>, window_params = [{transform_indices = @transform_0, window_bounds = array<i64: 1, 8, 256>}, {transform_indices = @transform_1, window_bounds = array<i64: 1, 8, 256>}, {transform_indices = @transform_2, window_bounds = array<i64: 1, 8, 8, 256>}, {transform_indices = @transform_3, window_bounds = array<i64: 1, 8, 8, 256>}, {transform_indices = @transform_4, window_bounds = array<i64: 1, 8, 256>}, {transform_indices = @transform_5, window_bounds = array<i64: 1, 8, 256>}]} {
    %c0 = arith.constant 0 : index
    %c0_0 = arith.constant 0 : index
    %c0_1 = arith.constant 0 : index
    %0 = vector.load %arg2[%c0, %c0_0, %c0_1] : memref<1x8x256xf32, #tpu.memory_space<vmem>>, vector<1x8x256xf32>
    %1 = vector.shape_cast %0 : vector<1x8x256xf32> to vector<8x256xf32>
    %c0_2 = arith.constant 0 : index
    %c0_3 = arith.constant 0 : index
    %c0_4 = arith.constant 0 : index
    %2 = vector.load %arg3[%c0_2, %c0_3, %c0_4] : memref<1x8x256xf32, #tpu.memory_space<vmem>>, vector<1x8x256xf32>
    %3 = vector.shape_cast %2 : vector<1x8x256xf32> to vector<8x256xf32>
    %c0_5 = arith.constant 0 : index
    %c0_6 = arith.constant 0 : index
    %c0_7 = arith.constant 0 : index
    %c0_8 = arith.constant 0 : index
    %4 = vector.load %arg4[%c0_5, %c0_6, %c0_7, %c0_8] : memref<1x8x8x256xf32, #tpu.memory_space<vmem>>, vector<1x1x8x256xf32>
    %5 = vector.shape_cast %4 : vector<1x1x8x256xf32> to vector<8x256xf32>
    %c0_9 = arith.constant 0 : index
    %c0_10 = arith.constant 0 : index
    %c0_11 = arith.constant 0 : index
    %c0_12 = arith.constant 0 : index
    %6 = vector.load %arg5[%c0_9, %c0_10, %c0_11, %c0_12] : memref<1x8x8x256xf32, #tpu.memory_space<vmem>>, vector<1x1x8x256xf32>
    %7 = vector.shape_cast %6 : vector<1x1x8x256xf32> to vector<8x256xf32>
    %8 = vector.extract_strided_slice %1 {offsets = [0, 0], sizes = [1, 256], strides = [1, 1]} : vector<8x256xf32> to vector<1x256xf32>
    %9 = vector.broadcast %8 : vector<1x256xf32> to vector<8x256xf32>
    %10 = arith.mulf %5, %9 : vector<8x256xf32>
    %11 = vector.extract_strided_slice %3 {offsets = [0, 0], sizes = [1, 256], strides = [1, 1]} : vector<8x256xf32> to vector<1x256xf32>
    %12 = vector.broadcast %11 : vector<1x256xf32> to vector<8x256xf32>
    %13 = arith.mulf %7, %12 : vector<8x256xf32>
    %14 = arith.subf %10, %13 : vector<8x256xf32>
    %15 = vector.extract_strided_slice %3 {offsets = [0, 0], sizes = [1, 256], strides = [1, 1]} : vector<8x256xf32> to vector<1x256xf32>
    %16 = vector.broadcast %15 : vector<1x256xf32> to vector<8x256xf32>
    %17 = arith.mulf %5, %16 : vector<8x256xf32>
    %18 = vector.extract_strided_slice %1 {offsets = [0, 0], sizes = [1, 256], strides = [1, 1]} : vector<8x256xf32> to vector<1x256xf32>
    %19 = vector.broadcast %18 : vector<1x256xf32> to vector<8x256xf32>
    %20 = arith.mulf %7, %19 : vector<8x256xf32>
    %21 = arith.addf %17, %20 : vector<8x256xf32>
    %c0_13 = arith.constant 0 : index
    %c1 = arith.constant 1 : index
    %c0_14 = arith.constant 0 : index
    %c0_15 = arith.constant 0 : index
    %22 = vector.load %arg4[%c0_13, %c1, %c0_14, %c0_15] : memref<1x8x8x256xf32, #tpu.memory_space<vmem>>, vector<1x1x8x256xf32>
    %23 = vector.shape_cast %22 : vector<1x1x8x256xf32> to vector<8x256xf32>
    %c0_16 = arith.constant 0 : index
    %c1_17 = arith.constant 1 : index
    %c0_18 = arith.constant 0 : index
    %c0_19 = arith.constant 0 : index
    %24 = vector.load %arg5[%c0_16, %c1_17, %c0_18, %c0_19] : memref<1x8x8x256xf32, #tpu.memory_space<vmem>>, vector<1x1x8x256xf32>
    %25 = vector.shape_cast %24 : vector<1x1x8x256xf32> to vector<8x256xf32>
    %26 = vector.extract_strided_slice %1 {offsets = [1, 0], sizes = [1, 256], strides = [1, 1]} : vector<8x256xf32> to vector<1x256xf32>
    %27 = vector.broadcast %26 : vector<1x256xf32> to vector<8x256xf32>
    %28 = arith.mulf %23, %27 : vector<8x256xf32>
    %29 = arith.addf %14, %28 : vector<8x256xf32>
    %30 = vector.extract_strided_slice %3 {offsets = [1, 0], sizes = [1, 256], strides = [1, 1]} : vector<8x256xf32> to vector<1x256xf32>
    %31 = vector.broadcast %30 : vector<1x256xf32> to vector<8x256xf32>
    %32 = arith.mulf %25, %31 : vector<8x256xf32>
    %33 = arith.subf %29, %32 : vector<8x256xf32>
    %34 = vector.extract_strided_slice %3 {offsets = [1, 0], sizes = [1, 256], strides = [1, 1]} : vector<8x256xf32> to vector<1x256xf32>
    %35 = vector.broadcast %34 : vector<1x256xf32> to vector<8x256xf32>
    %36 = arith.mulf %23, %35 : vector<8x256xf32>
    %37 = arith.addf %21, %36 : vector<8x256xf32>
    %38 = vector.extract_strided_slice %1 {offsets = [1, 0], sizes = [1, 256], strides = [1, 1]} : vector<8x256xf32> to vector<1x256xf32>
    %39 = vector.broadcast %38 : vector<1x256xf32> to vector<8x256xf32>
    %40 = arith.mulf %25, %39 : vector<8x256xf32>
    %41 = arith.addf %37, %40 : vector<8x256xf32>
    %c0_20 = arith.constant 0 : index
    %c2 = arith.constant 2 : index
    %c0_21 = arith.constant 0 : index
    %c0_22 = arith.constant 0 : index
    %42 = vector.load %arg4[%c0_20, %c2, %c0_21, %c0_22] : memref<1x8x8x256xf32, #tpu.memory_space<vmem>>, vector<1x1x8x256xf32>
    %43 = vector.shape_cast %42 : vector<1x1x8x256xf32> to vector<8x256xf32>
    %c0_23 = arith.constant 0 : index
    %c2_24 = arith.constant 2 : index
    %c0_25 = arith.constant 0 : index
    %c0_26 = arith.constant 0 : index
    %44 = vector.load %arg5[%c0_23, %c2_24, %c0_25, %c0_26] : memref<1x8x8x256xf32, #tpu.memory_space<vmem>>, vector<1x1x8x256xf32>
    %45 = vector.shape_cast %44 : vector<1x1x8x256xf32> to vector<8x256xf32>
    %46 = vector.extract_strided_slice %1 {offsets = [2, 0], sizes = [1, 256], strides = [1, 1]} : vector<8x256xf32> to vector<1x256xf32>
    %47 = vector.broadcast %46 : vector<1x256xf32> to vector<8x256xf32>
    %48 = arith.mulf %43, %47 : vector<8x256xf32>
    %49 = arith.addf %33, %48 : vector<8x256xf32>
    %50 = vector.extract_strided_slice %3 {offsets = [2, 0], sizes = [1, 256], strides = [1, 1]} : vector<8x256xf32> to vector<1x256xf32>
    %51 = vector.broadcast %50 : vector<1x256xf32> to vector<8x256xf32>
    %52 = arith.mulf %45, %51 : vector<8x256xf32>
    %53 = arith.subf %49, %52 : vector<8x256xf32>
    %54 = vector.extract_strided_slice %3 {offsets = [2, 0], sizes = [1, 256], strides = [1, 1]} : vector<8x256xf32> to vector<1x256xf32>
    %55 = vector.broadcast %54 : vector<1x256xf32> to vector<8x256xf32>
    %56 = arith.mulf %43, %55 : vector<8x256xf32>
    %57 = arith.addf %41, %56 : vector<8x256xf32>
    %58 = vector.extract_strided_slice %1 {offsets = [2, 0], sizes = [1, 256], strides = [1, 1]} : vector<8x256xf32> to vector<1x256xf32>
    %59 = vector.broadcast %58 : vector<1x256xf32> to vector<8x256xf32>
    %60 = arith.mulf %45, %59 : vector<8x256xf32>
    %61 = arith.addf %57, %60 : vector<8x256xf32>
    %c0_27 = arith.constant 0 : index
    %c3 = arith.constant 3 : index
    %c0_28 = arith.constant 0 : index
    %c0_29 = arith.constant 0 : index
    %62 = vector.load %arg4[%c0_27, %c3, %c0_28, %c0_29] : memref<1x8x8x256xf32, #tpu.memory_space<vmem>>, vector<1x1x8x256xf32>
    %63 = vector.shape_cast %62 : vector<1x1x8x256xf32> to vector<8x256xf32>
    %c0_30 = arith.constant 0 : index
    %c3_31 = arith.constant 3 : index
    %c0_32 = arith.constant 0 : index
    %c0_33 = arith.constant 0 : index
    %64 = vector.load %arg5[%c0_30, %c3_31, %c0_32, %c0_33] : memref<1x8x8x256xf32, #tpu.memory_space<vmem>>, vector<1x1x8x256xf32>
    %65 = vector.shape_cast %64 : vector<1x1x8x256xf32> to vector<8x256xf32>
    %66 = vector.extract_strided_slice %1 {offsets = [3, 0], sizes = [1, 256], strides = [1, 1]} : vector<8x256xf32> to vector<1x256xf32>
    %67 = vector.broadcast %66 : vector<1x256xf32> to vector<8x256xf32>
    %68 = arith.mulf %63, %67 : vector<8x256xf32>
    %69 = arith.addf %53, %68 : vector<8x256xf32>
    %70 = vector.extract_strided_slice %3 {offsets = [3, 0], sizes = [1, 256], strides = [1, 1]} : vector<8x256xf32> to vector<1x256xf32>
    %71 = vector.broadcast %70 : vector<1x256xf32> to vector<8x256xf32>
    %72 = arith.mulf %65, %71 : vector<8x256xf32>
    %73 = arith.subf %69, %72 : vector<8x256xf32>
    %74 = vector.extract_strided_slice %3 {offsets = [3, 0], sizes = [1, 256], strides = [1, 1]} : vector<8x256xf32> to vector<1x256xf32>
    %75 = vector.broadcast %74 : vector<1x256xf32> to vector<8x256xf32>
    %76 = arith.mulf %63, %75 : vector<8x256xf32>
    %77 = arith.addf %61, %76 : vector<8x256xf32>
    %78 = vector.extract_strided_slice %1 {offsets = [3, 0], sizes = [1, 256], strides = [1, 1]} : vector<8x256xf32> to vector<1x256xf32>
    %79 = vector.broadcast %78 : vector<1x256xf32> to vector<8x256xf32>
    %80 = arith.mulf %65, %79 : vector<8x256xf32>
    %81 = arith.addf %77, %80 : vector<8x256xf32>
    %c0_34 = arith.constant 0 : index
    %c4 = arith.constant 4 : index
    %c0_35 = arith.constant 0 : index
    %c0_36 = arith.constant 0 : index
    %82 = vector.load %arg4[%c0_34, %c4, %c0_35, %c0_36] : memref<1x8x8x256xf32, #tpu.memory_space<vmem>>, vector<1x1x8x256xf32>
    %83 = vector.shape_cast %82 : vector<1x1x8x256xf32> to vector<8x256xf32>
    %c0_37 = arith.constant 0 : index
    %c4_38 = arith.constant 4 : index
    %c0_39 = arith.constant 0 : index
    %c0_40 = arith.constant 0 : index
    %84 = vector.load %arg5[%c0_37, %c4_38, %c0_39, %c0_40] : memref<1x8x8x256xf32, #tpu.memory_space<vmem>>, vector<1x1x8x256xf32>
    %85 = vector.shape_cast %84 : vector<1x1x8x256xf32> to vector<8x256xf32>
    %86 = vector.extract_strided_slice %1 {offsets = [4, 0], sizes = [1, 256], strides = [1, 1]} : vector<8x256xf32> to vector<1x256xf32>
    %87 = vector.broadcast %86 : vector<1x256xf32> to vector<8x256xf32>
    %88 = arith.mulf %83, %87 : vector<8x256xf32>
    %89 = arith.addf %73, %88 : vector<8x256xf32>
    %90 = vector.extract_strided_slice %3 {offsets = [4, 0], sizes = [1, 256], strides = [1, 1]} : vector<8x256xf32> to vector<1x256xf32>
    %91 = vector.broadcast %90 : vector<1x256xf32> to vector<8x256xf32>
    %92 = arith.mulf %85, %91 : vector<8x256xf32>
    %93 = arith.subf %89, %92 : vector<8x256xf32>
    %94 = vector.extract_strided_slice %3 {offsets = [4, 0], sizes = [1, 256], strides = [1, 1]} : vector<8x256xf32> to vector<1x256xf32>
    %95 = vector.broadcast %94 : vector<1x256xf32> to vector<8x256xf32>
    %96 = arith.mulf %83, %95 : vector<8x256xf32>
    %97 = arith.addf %81, %96 : vector<8x256xf32>
    %98 = vector.extract_strided_slice %1 {offsets = [4, 0], sizes = [1, 256], strides = [1, 1]} : vector<8x256xf32> to vector<1x256xf32>
    %99 = vector.broadcast %98 : vector<1x256xf32> to vector<8x256xf32>
    %100 = arith.mulf %85, %99 : vector<8x256xf32>
    %101 = arith.addf %97, %100 : vector<8x256xf32>
    %c0_41 = arith.constant 0 : index
    %c5 = arith.constant 5 : index
    %c0_42 = arith.constant 0 : index
    %c0_43 = arith.constant 0 : index
    %102 = vector.load %arg4[%c0_41, %c5, %c0_42, %c0_43] : memref<1x8x8x256xf32, #tpu.memory_space<vmem>>, vector<1x1x8x256xf32>
    %103 = vector.shape_cast %102 : vector<1x1x8x256xf32> to vector<8x256xf32>
    %c0_44 = arith.constant 0 : index
    %c5_45 = arith.constant 5 : index
    %c0_46 = arith.constant 0 : index
    %c0_47 = arith.constant 0 : index
    %104 = vector.load %arg5[%c0_44, %c5_45, %c0_46, %c0_47] : memref<1x8x8x256xf32, #tpu.memory_space<vmem>>, vector<1x1x8x256xf32>
    %105 = vector.shape_cast %104 : vector<1x1x8x256xf32> to vector<8x256xf32>
    %106 = vector.extract_strided_slice %1 {offsets = [5, 0], sizes = [1, 256], strides = [1, 1]} : vector<8x256xf32> to vector<1x256xf32>
    %107 = vector.broadcast %106 : vector<1x256xf32> to vector<8x256xf32>
    %108 = arith.mulf %103, %107 : vector<8x256xf32>
    %109 = arith.addf %93, %108 : vector<8x256xf32>
    %110 = vector.extract_strided_slice %3 {offsets = [5, 0], sizes = [1, 256], strides = [1, 1]} : vector<8x256xf32> to vector<1x256xf32>
    %111 = vector.broadcast %110 : vector<1x256xf32> to vector<8x256xf32>
    %112 = arith.mulf %105, %111 : vector<8x256xf32>
    %113 = arith.subf %109, %112 : vector<8x256xf32>
    %114 = vector.extract_strided_slice %3 {offsets = [5, 0], sizes = [1, 256], strides = [1, 1]} : vector<8x256xf32> to vector<1x256xf32>
    %115 = vector.broadcast %114 : vector<1x256xf32> to vector<8x256xf32>
    %116 = arith.mulf %103, %115 : vector<8x256xf32>
    %117 = arith.addf %101, %116 : vector<8x256xf32>
    %118 = vector.extract_strided_slice %1 {offsets = [5, 0], sizes = [1, 256], strides = [1, 1]} : vector<8x256xf32> to vector<1x256xf32>
    %119 = vector.broadcast %118 : vector<1x256xf32> to vector<8x256xf32>
    %120 = arith.mulf %105, %119 : vector<8x256xf32>
    %121 = arith.addf %117, %120 : vector<8x256xf32>
    %c0_48 = arith.constant 0 : index
    %c6 = arith.constant 6 : index
    %c0_49 = arith.constant 0 : index
    %c0_50 = arith.constant 0 : index
    %122 = vector.load %arg4[%c0_48, %c6, %c0_49, %c0_50] : memref<1x8x8x256xf32, #tpu.memory_space<vmem>>, vector<1x1x8x256xf32>
    %123 = vector.shape_cast %122 : vector<1x1x8x256xf32> to vector<8x256xf32>
    %c0_51 = arith.constant 0 : index
    %c6_52 = arith.constant 6 : index
    %c0_53 = arith.constant 0 : index
    %c0_54 = arith.constant 0 : index
    %124 = vector.load %arg5[%c0_51, %c6_52, %c0_53, %c0_54] : memref<1x8x8x256xf32, #tpu.memory_space<vmem>>, vector<1x1x8x256xf32>
    %125 = vector.shape_cast %124 : vector<1x1x8x256xf32> to vector<8x256xf32>
    %126 = vector.extract_strided_slice %1 {offsets = [6, 0], sizes = [1, 256], strides = [1, 1]} : vector<8x256xf32> to vector<1x256xf32>
    %127 = vector.broadcast %126 : vector<1x256xf32> to vector<8x256xf32>
    %128 = arith.mulf %123, %127 : vector<8x256xf32>
    %129 = arith.addf %113, %128 : vector<8x256xf32>
    %130 = vector.extract_strided_slice %3 {offsets = [6, 0], sizes = [1, 256], strides = [1, 1]} : vector<8x256xf32> to vector<1x256xf32>
    %131 = vector.broadcast %130 : vector<1x256xf32> to vector<8x256xf32>
    %132 = arith.mulf %125, %131 : vector<8x256xf32>
    %133 = arith.subf %129, %132 : vector<8x256xf32>
    %134 = vector.extract_strided_slice %3 {offsets = [6, 0], sizes = [1, 256], strides = [1, 1]} : vector<8x256xf32> to vector<1x256xf32>
    %135 = vector.broadcast %134 : vector<1x256xf32> to vector<8x256xf32>
    %136 = arith.mulf %123, %135 : vector<8x256xf32>
    %137 = arith.addf %121, %136 : vector<8x256xf32>
    %138 = vector.extract_strided_slice %1 {offsets = [6, 0], sizes = [1, 256], strides = [1, 1]} : vector<8x256xf32> to vector<1x256xf32>
    %139 = vector.broadcast %138 : vector<1x256xf32> to vector<8x256xf32>
    %140 = arith.mulf %125, %139 : vector<8x256xf32>
    %141 = arith.addf %137, %140 : vector<8x256xf32>
    %c0_55 = arith.constant 0 : index
    %c7 = arith.constant 7 : index
    %c0_56 = arith.constant 0 : index
    %c0_57 = arith.constant 0 : index
    %142 = vector.load %arg4[%c0_55, %c7, %c0_56, %c0_57] : memref<1x8x8x256xf32, #tpu.memory_space<vmem>>, vector<1x1x8x256xf32>
    %143 = vector.shape_cast %142 : vector<1x1x8x256xf32> to vector<8x256xf32>
    %c0_58 = arith.constant 0 : index
    %c7_59 = arith.constant 7 : index
    %c0_60 = arith.constant 0 : index
    %c0_61 = arith.constant 0 : index
    %144 = vector.load %arg5[%c0_58, %c7_59, %c0_60, %c0_61] : memref<1x8x8x256xf32, #tpu.memory_space<vmem>>, vector<1x1x8x256xf32>
    %145 = vector.shape_cast %144 : vector<1x1x8x256xf32> to vector<8x256xf32>
    %146 = vector.extract_strided_slice %1 {offsets = [7, 0], sizes = [1, 256], strides = [1, 1]} : vector<8x256xf32> to vector<1x256xf32>
    %147 = vector.broadcast %146 : vector<1x256xf32> to vector<8x256xf32>
    %148 = arith.mulf %143, %147 : vector<8x256xf32>
    %149 = arith.addf %133, %148 : vector<8x256xf32>
    %150 = vector.extract_strided_slice %3 {offsets = [7, 0], sizes = [1, 256], strides = [1, 1]} : vector<8x256xf32> to vector<1x256xf32>
    %151 = vector.broadcast %150 : vector<1x256xf32> to vector<8x256xf32>
    %152 = arith.mulf %145, %151 : vector<8x256xf32>
    %153 = arith.subf %149, %152 : vector<8x256xf32>
    %154 = vector.extract_strided_slice %3 {offsets = [7, 0], sizes = [1, 256], strides = [1, 1]} : vector<8x256xf32> to vector<1x256xf32>
    %155 = vector.broadcast %154 : vector<1x256xf32> to vector<8x256xf32>
    %156 = arith.mulf %143, %155 : vector<8x256xf32>
    %157 = arith.addf %141, %156 : vector<8x256xf32>
    %158 = vector.extract_strided_slice %1 {offsets = [7, 0], sizes = [1, 256], strides = [1, 1]} : vector<8x256xf32> to vector<1x256xf32>
    %159 = vector.broadcast %158 : vector<1x256xf32> to vector<8x256xf32>
    %160 = arith.mulf %145, %159 : vector<8x256xf32>
    %161 = arith.addf %157, %160 : vector<8x256xf32>
    %c0_62 = arith.constant 0 : index
    %c0_63 = arith.constant 0 : index
    %c0_64 = arith.constant 0 : index
    %162 = vector.load %arg6[%c0_62, %c0_63, %c0_64] : memref<1x8x256xf32, #tpu.memory_space<vmem>>, vector<1x8x256xf32>
    %163 = vector.shape_cast %162 : vector<1x8x256xf32> to vector<8x256xf32>
    %164 = vector.shape_cast %153 : vector<8x256xf32> to vector<1x8x256xf32>
    tpu.vector_store %arg6[%c0_62, %c0_63, %c0_64], %164 {strides = array<i32>} : memref<1x8x256xf32, #tpu.memory_space<vmem>>, vector<1x8x256xf32>,
    %c0_65 = arith.constant 0 : index
    %c0_66 = arith.constant 0 : index
    %c0_67 = arith.constant 0 : index
    %165 = vector.load %arg7[%c0_65, %c0_66, %c0_67] : memref<1x8x256xf32, #tpu.memory_space<vmem>>, vector<1x8x256xf32>
    %166 = vector.shape_cast %165 : vector<1x8x256xf32> to vector<8x256xf32>
    %167 = vector.shape_cast %161 : vector<8x256xf32> to vector<1x8x256xf32>
    tpu.vector_store %arg7[%c0_65, %c0_66, %c0_67], %167 {strides = array<i32>} : memref<1x8x256xf32, #tpu.memory_space<vmem>>, vector<1x8x256xf32>,
    return
  }
  func.func @transform_0(%arg0: i32, %arg1: i32) -> (i32, i32, i32) {
    %c0_i32 = arith.constant 0 : i32
    %c0_i32_0 = arith.constant 0 : i32
    return %arg1, %c0_i32, %arg0 : i32, i32, i32
  }
  func.func @transform_1(%arg0: i32, %arg1: i32) -> (i32, i32, i32) {
    %c0_i32 = arith.constant 0 : i32
    %c0_i32_0 = arith.constant 0 : i32
    return %arg1, %c0_i32, %arg0 : i32, i32, i32
  }
  func.func @transform_2(%arg0: i32, %arg1: i32) -> (i32, i32, i32, i32) {
    %c0_i32 = arith.constant 0 : i32
    %c0_i32_0 = arith.constant 0 : i32
    %c0_i32_1 = arith.constant 0 : i32
    %c0_i32_2 = arith.constant 0 : i32
    return %arg0, %c0_i32, %c0_i32_0, %c0_i32_1 : i32, i32, i32, i32
  }
  func.func @transform_3(%arg0: i32, %arg1: i32) -> (i32, i32, i32, i32) {
    %c0_i32 = arith.constant 0 : i32
    %c0_i32_0 = arith.constant 0 : i32
    %c0_i32_1 = arith.constant 0 : i32
    %c0_i32_2 = arith.constant 0 : i32
    return %arg0, %c0_i32, %c0_i32_0, %c0_i32_1 : i32, i32, i32, i32
  }
  func.func @transform_4(%arg0: i32, %arg1: i32) -> (i32, i32, i32) {
    %c0_i32 = arith.constant 0 : i32
    %c0_i32_0 = arith.constant 0 : i32
    return %arg1, %c0_i32, %arg0 : i32, i32, i32
  }
  func.func @transform_5(%arg0: i32, %arg1: i32) -> (i32, i32, i32) {
    %c0_i32 = arith.constant 0 : i32
    %c0_i32_0 = arith.constant 0 : i32
    return %arg1, %c0_i32, %arg0 : i32, i32, i32
  }
}

module attributes {stable_mosaic.version = 11 : i64} {
  func.func @_cf_linear_res_kernel(%arg0: i32, %arg1: i32, %arg2: memref<1x8x512xf32, #tpu.memory_space<vmem>>, %arg3: memref<8x8xf32, #tpu.memory_space<vmem>>, %arg4: memref<8x1xf32, #tpu.memory_space<vmem>>, %arg5: memref<1x8x512xf32, #tpu.memory_space<vmem>>, %arg6: memref<1x8x512xf32, #tpu.memory_space<vmem>>) attributes {dimension_semantics = [#tpu.dimension_semantics<parallel>, #tpu.dimension_semantics<parallel>], iteration_bounds = array<i64: 2, 1>, scalar_prefetch = 0 : i64, scratch_operands = 0 : i64, tpu.core_type = #tpu.core_type<tc>, window_params = [{transform_indices = @transform_0, window_bounds = array<i64: 1, 8, 512>}, {pipeline_mode = #tpu.pipeline_mode<synchronous>, transform_indices = @transform_1, window_bounds = array<i64: 8, 8>}, {pipeline_mode = #tpu.pipeline_mode<synchronous>, transform_indices = @transform_2, window_bounds = array<i64: 8, 1>}, {transform_indices = @transform_3, window_bounds = array<i64: 1, 8, 512>}, {transform_indices = @transform_4, window_bounds = array<i64: 1, 8, 512>}]} {
    %c0 = arith.constant 0 : index
    %c0_0 = arith.constant 0 : index
    %0 = vector.load %arg3[%c0, %c0_0] : memref<8x8xf32, #tpu.memory_space<vmem>>, vector<8x8xf32>
    %c0_1 = arith.constant 0 : index
    %c0_2 = arith.constant 0 : index
    %c0_3 = arith.constant 0 : index
    %1 = vector.load %arg2[%c0_1, %c0_2, %c0_3] : memref<1x8x512xf32, #tpu.memory_space<vmem>>, vector<1x8x512xf32>
    %2 = vector.shape_cast %1 : vector<1x8x512xf32> to vector<8x512xf32>
    %cst = arith.constant dense<0.000000e+00> : vector<8x512xf32>
    %3 = tpu.matmul %0, %2, %cst {dimension_numbers = #tpu.dot_dimension_numbers<[1], [0], [0], [1], [0, 0, 1, 1], [], []>} : vector<8x8xf32>, vector<8x512xf32>, vector<8x512xf32> -> vector<8x512xf32>
    %c0_4 = arith.constant 0 : index
    %c0_5 = arith.constant 0 : index
    %4 = vector.load %arg4[%c0_4, %c0_5] : memref<8x1xf32, #tpu.memory_space<vmem>>, vector<8x1xf32>
    %5 = vector.broadcast %4 : vector<8x1xf32> to vector<8x512xf32>
    %6 = arith.addf %3, %5 : vector<8x512xf32>
    %c0_6 = arith.constant 0 : index
    %c0_7 = arith.constant 0 : index
    %c0_8 = arith.constant 0 : index
    %7 = vector.load %arg5[%c0_6, %c0_7, %c0_8] : memref<1x8x512xf32, #tpu.memory_space<vmem>>, vector<1x8x512xf32>
    %8 = vector.shape_cast %7 : vector<1x8x512xf32> to vector<8x512xf32>
    %9 = arith.addf %6, %8 : vector<8x512xf32>
    %10 = math.tanh %9 : vector<8x512xf32>
    %c0_9 = arith.constant 0 : index
    %c0_10 = arith.constant 0 : index
    %c0_11 = arith.constant 0 : index
    %11 = vector.load %arg6[%c0_9, %c0_10, %c0_11] : memref<1x8x512xf32, #tpu.memory_space<vmem>>, vector<1x8x512xf32>
    %12 = vector.shape_cast %11 : vector<1x8x512xf32> to vector<8x512xf32>
    %13 = vector.shape_cast %10 : vector<8x512xf32> to vector<1x8x512xf32>
    tpu.vector_store %arg6[%c0_9, %c0_10, %c0_11], %13 {strides = array<i32>} : memref<1x8x512xf32, #tpu.memory_space<vmem>>, vector<1x8x512xf32>,
    return
  }
  func.func @transform_0(%arg0: i32, %arg1: i32) -> (i32, i32, i32) {
    %c0_i32 = arith.constant 0 : i32
    %c0_i32_0 = arith.constant 0 : i32
    return %arg0, %c0_i32, %arg1 : i32, i32, i32
  }
  func.func @transform_1(%arg0: i32, %arg1: i32) -> (i32, i32) {
    %c0_i32 = arith.constant 0 : i32
    %c0_i32_0 = arith.constant 0 : i32
    %c0_i32_1 = arith.constant 0 : i32
    return %c0_i32, %c0_i32_0 : i32, i32
  }
  func.func @transform_2(%arg0: i32, %arg1: i32) -> (i32, i32) {
    %c0_i32 = arith.constant 0 : i32
    %c0_i32_0 = arith.constant 0 : i32
    %c0_i32_1 = arith.constant 0 : i32
    return %c0_i32, %c0_i32_0 : i32, i32
  }
  func.func @transform_3(%arg0: i32, %arg1: i32) -> (i32, i32, i32) {
    %c0_i32 = arith.constant 0 : i32
    %c0_i32_0 = arith.constant 0 : i32
    return %arg0, %c0_i32, %arg1 : i32, i32, i32
  }
  func.func @transform_4(%arg0: i32, %arg1: i32) -> (i32, i32, i32) {
    %c0_i32 = arith.constant 0 : i32
    %c0_i32_0 = arith.constant 0 : i32
    return %arg0, %c0_i32, %arg1 : i32, i32, i32
  }
}

module attributes {stable_mosaic.version = 11 : i64} {
  func.func @_cf_linear_res_kernel(%arg0: i32, %arg1: i32, %arg2: memref<1x8x512xf32, #tpu.memory_space<vmem>>, %arg3: memref<8x8xf32, #tpu.memory_space<vmem>>, %arg4: memref<8x1xf32, #tpu.memory_space<vmem>>, %arg5: memref<1x8x512xf32, #tpu.memory_space<vmem>>, %arg6: memref<1x8x512xf32, #tpu.memory_space<vmem>>) attributes {dimension_semantics = [#tpu.dimension_semantics<parallel>, #tpu.dimension_semantics<parallel>], iteration_bounds = array<i64: 2, 1>, scalar_prefetch = 0 : i64, scratch_operands = 0 : i64, tpu.core_type = #tpu.core_type<tc>, window_params = [{transform_indices = @transform_0, window_bounds = array<i64: 1, 8, 512>}, {pipeline_mode = #tpu.pipeline_mode<synchronous>, transform_indices = @transform_1, window_bounds = array<i64: 8, 8>}, {pipeline_mode = #tpu.pipeline_mode<synchronous>, transform_indices = @transform_2, window_bounds = array<i64: 8, 1>}, {transform_indices = @transform_3, window_bounds = array<i64: 1, 8, 512>}, {transform_indices = @transform_4, window_bounds = array<i64: 1, 8, 512>}]} {
    %c0 = arith.constant 0 : index
    %c0_0 = arith.constant 0 : index
    %0 = vector.load %arg3[%c0, %c0_0] : memref<8x8xf32, #tpu.memory_space<vmem>>, vector<8x8xf32>
    %c0_1 = arith.constant 0 : index
    %c0_2 = arith.constant 0 : index
    %c0_3 = arith.constant 0 : index
    %1 = vector.load %arg2[%c0_1, %c0_2, %c0_3] : memref<1x8x512xf32, #tpu.memory_space<vmem>>, vector<1x8x512xf32>
    %2 = vector.shape_cast %1 : vector<1x8x512xf32> to vector<8x512xf32>
    %cst = arith.constant dense<0.000000e+00> : vector<8x512xf32>
    %3 = tpu.matmul %0, %2, %cst {dimension_numbers = #tpu.dot_dimension_numbers<[1], [0], [0], [1], [0, 0, 1, 1], [], []>} : vector<8x8xf32>, vector<8x512xf32>, vector<8x512xf32> -> vector<8x512xf32>
    %c0_4 = arith.constant 0 : index
    %c0_5 = arith.constant 0 : index
    %4 = vector.load %arg4[%c0_4, %c0_5] : memref<8x1xf32, #tpu.memory_space<vmem>>, vector<8x1xf32>
    %5 = vector.broadcast %4 : vector<8x1xf32> to vector<8x512xf32>
    %6 = arith.addf %3, %5 : vector<8x512xf32>
    %c0_6 = arith.constant 0 : index
    %c0_7 = arith.constant 0 : index
    %c0_8 = arith.constant 0 : index
    %7 = vector.load %arg5[%c0_6, %c0_7, %c0_8] : memref<1x8x512xf32, #tpu.memory_space<vmem>>, vector<1x8x512xf32>
    %8 = vector.shape_cast %7 : vector<1x8x512xf32> to vector<8x512xf32>
    %9 = arith.addf %6, %8 : vector<8x512xf32>
    %c0_9 = arith.constant 0 : index
    %c0_10 = arith.constant 0 : index
    %c0_11 = arith.constant 0 : index
    %10 = vector.load %arg6[%c0_9, %c0_10, %c0_11] : memref<1x8x512xf32, #tpu.memory_space<vmem>>, vector<1x8x512xf32>
    %11 = vector.shape_cast %10 : vector<1x8x512xf32> to vector<8x512xf32>
    %12 = vector.shape_cast %9 : vector<8x512xf32> to vector<1x8x512xf32>
    tpu.vector_store %arg6[%c0_9, %c0_10, %c0_11], %12 {strides = array<i32>} : memref<1x8x512xf32, #tpu.memory_space<vmem>>, vector<1x8x512xf32>,
    return
  }
  func.func @transform_0(%arg0: i32, %arg1: i32) -> (i32, i32, i32) {
    %c0_i32 = arith.constant 0 : i32
    %c0_i32_0 = arith.constant 0 : i32
    return %arg0, %c0_i32, %arg1 : i32, i32, i32
  }
  func.func @transform_1(%arg0: i32, %arg1: i32) -> (i32, i32) {
    %c0_i32 = arith.constant 0 : i32
    %c0_i32_0 = arith.constant 0 : i32
    %c0_i32_1 = arith.constant 0 : i32
    return %c0_i32, %c0_i32_0 : i32, i32
  }
  func.func @transform_2(%arg0: i32, %arg1: i32) -> (i32, i32) {
    %c0_i32 = arith.constant 0 : i32
    %c0_i32_0 = arith.constant 0 : i32
    %c0_i32_1 = arith.constant 0 : i32
    return %c0_i32, %c0_i32_0 : i32, i32
  }
  func.func @transform_3(%arg0: i32, %arg1: i32) -> (i32, i32, i32) {
    %c0_i32 = arith.constant 0 : i32
    %c0_i32_0 = arith.constant 0 : i32
    return %arg0, %c0_i32, %arg1 : i32, i32, i32
  }
  func.func @transform_4(%arg0: i32, %arg1: i32) -> (i32, i32, i32) {
    %c0_i32 = arith.constant 0 : i32
    %c0_i32_0 = arith.constant 0 : i32
    return %arg0, %c0_i32, %arg1 : i32, i32, i32
  }
}

module attributes {stable_mosaic.version = 11 : i64} {
  func.func @_mlp_head_kernel(%arg0: i32, %arg1: i32, %arg2: memref<1x8x512xf32, #tpu.memory_space<vmem>>, %arg3: memref<32x8xf32, #tpu.memory_space<vmem>>, %arg4: memref<32x1xf32, #tpu.memory_space<vmem>>, %arg5: memref<3x32xf32, #tpu.memory_space<vmem>>, %arg6: memref<3x1xf32, #tpu.memory_space<vmem>>, %arg7: memref<1x3x512xf32, #tpu.memory_space<vmem>>) attributes {dimension_semantics = [#tpu.dimension_semantics<parallel>, #tpu.dimension_semantics<parallel>], iteration_bounds = array<i64: 2, 1>, scalar_prefetch = 0 : i64, scratch_operands = 0 : i64, tpu.core_type = #tpu.core_type<tc>, window_params = [{transform_indices = @transform_0, window_bounds = array<i64: 1, 8, 512>}, {pipeline_mode = #tpu.pipeline_mode<synchronous>, transform_indices = @transform_1, window_bounds = array<i64: 32, 8>}, {pipeline_mode = #tpu.pipeline_mode<synchronous>, transform_indices = @transform_2, window_bounds = array<i64: 32, 1>}, {pipeline_mode = #tpu.pipeline_mode<synchronous>, transform_indices = @transform_3, window_bounds = array<i64: 3, 32>}, {pipeline_mode = #tpu.pipeline_mode<synchronous>, transform_indices = @transform_4, window_bounds = array<i64: 3, 1>}, {transform_indices = @transform_5, window_bounds = array<i64: 1, 3, 512>}]} {
    %c0 = arith.constant 0 : index
    %c0_0 = arith.constant 0 : index
    %0 = vector.load %arg3[%c0, %c0_0] : memref<32x8xf32, #tpu.memory_space<vmem>>, vector<32x8xf32>
    %c0_1 = arith.constant 0 : index
    %c0_2 = arith.constant 0 : index
    %c0_3 = arith.constant 0 : index
    %1 = vector.load %arg2[%c0_1, %c0_2, %c0_3] : memref<1x8x512xf32, #tpu.memory_space<vmem>>, vector<1x8x512xf32>
    %2 = vector.shape_cast %1 : vector<1x8x512xf32> to vector<8x512xf32>
    %cst = arith.constant dense<0.000000e+00> : vector<32x512xf32>
    %3 = tpu.matmul %0, %2, %cst {dimension_numbers = #tpu.dot_dimension_numbers<[1], [0], [0], [1], [0, 0, 1, 1], [], []>} : vector<32x8xf32>, vector<8x512xf32>, vector<32x512xf32> -> vector<32x512xf32>
    %c0_4 = arith.constant 0 : index
    %c0_5 = arith.constant 0 : index
    %4 = vector.load %arg4[%c0_4, %c0_5] : memref<32x1xf32, #tpu.memory_space<vmem>>, vector<32x1xf32>
    %5 = vector.broadcast %4 : vector<32x1xf32> to vector<32x512xf32>
    %6 = arith.addf %3, %5 : vector<32x512xf32>
    %7 = math.tanh %6 : vector<32x512xf32>
    %c0_6 = arith.constant 0 : index
    %c0_7 = arith.constant 0 : index
    %8 = vector.load %arg5[%c0_6, %c0_7] : memref<3x32xf32, #tpu.memory_space<vmem>>, vector<3x32xf32>
    %cst_8 = arith.constant dense<0.000000e+00> : vector<3x512xf32>
    %9 = tpu.matmul %8, %7, %cst_8 {dimension_numbers = #tpu.dot_dimension_numbers<[1], [0], [0], [1], [0, 0, 1, 1], [], []>} : vector<3x32xf32>, vector<32x512xf32>, vector<3x512xf32> -> vector<3x512xf32>
    %c0_9 = arith.constant 0 : index
    %c0_10 = arith.constant 0 : index
    %10 = vector.load %arg6[%c0_9, %c0_10] : memref<3x1xf32, #tpu.memory_space<vmem>>, vector<3x1xf32>
    %11 = vector.broadcast %10 : vector<3x1xf32> to vector<3x512xf32>
    %12 = arith.addf %9, %11 : vector<3x512xf32>
    %c0_11 = arith.constant 0 : index
    %c0_12 = arith.constant 0 : index
    %c0_13 = arith.constant 0 : index
    %13 = vector.load %arg7[%c0_11, %c0_12, %c0_13] : memref<1x3x512xf32, #tpu.memory_space<vmem>>, vector<1x3x512xf32>
    %14 = vector.shape_cast %13 : vector<1x3x512xf32> to vector<3x512xf32>
    %15 = vector.shape_cast %12 : vector<3x512xf32> to vector<1x3x512xf32>
    tpu.vector_store %arg7[%c0_11, %c0_12, %c0_13], %15 {strides = array<i32>} : memref<1x3x512xf32, #tpu.memory_space<vmem>>, vector<1x3x512xf32>,
    return
  }
  func.func @transform_0(%arg0: i32, %arg1: i32) -> (i32, i32, i32) {
    %c0_i32 = arith.constant 0 : i32
    %c0_i32_0 = arith.constant 0 : i32
    return %arg0, %c0_i32, %arg1 : i32, i32, i32
  }
  func.func @transform_1(%arg0: i32, %arg1: i32) -> (i32, i32) {
    %c0_i32 = arith.constant 0 : i32
    %c0_i32_0 = arith.constant 0 : i32
    %c0_i32_1 = arith.constant 0 : i32
    return %c0_i32, %c0_i32_0 : i32, i32
  }
  func.func @transform_2(%arg0: i32, %arg1: i32) -> (i32, i32) {
    %c0_i32 = arith.constant 0 : i32
    %c0_i32_0 = arith.constant 0 : i32
    %c0_i32_1 = arith.constant 0 : i32
    return %c0_i32, %c0_i32_0 : i32, i32
  }
  func.func @transform_3(%arg0: i32, %arg1: i32) -> (i32, i32) {
    %c0_i32 = arith.constant 0 : i32
    %c0_i32_0 = arith.constant 0 : i32
    %c0_i32_1 = arith.constant 0 : i32
    return %c0_i32, %c0_i32_0 : i32, i32
  }
  func.func @transform_4(%arg0: i32, %arg1: i32) -> (i32, i32) {
    %c0_i32 = arith.constant 0 : i32
    %c0_i32_0 = arith.constant 0 : i32
    %c0_i32_1 = arith.constant 0 : i32
    return %c0_i32, %c0_i32_0 : i32, i32
  }
  func.func @transform_5(%arg0: i32, %arg1: i32) -> (i32, i32, i32) {
    %c0_i32 = arith.constant 0 : i32
    %c0_i32_0 = arith.constant 0 : i32
    return %arg0, %c0_i32, %arg1 : i32, i32, i32
  }
}

</mosaic_0001>

<bundles_post_ra>
// kernel: _lambda_.8
= control target key start
LH: loop header
LB: loop body
LE: loop exit
PB: predicated region body
PF: predicated region fallthrough
CT: control target
= control target key end

     0   :  { %s504_s12 = smov 0   ;;  %s506_s13 = smov 0   ;;  %s543_s0 = inlined_call_operand.vmem [shape: f32[2,3,512], index: 0, kind: input, shape index: {}]   ;;  %s544_s1 = inlined_call_operand.vmem [shape: f32[8,3], index: 1, kind: input, shape index: {}]   ;;  %s545_s2 = inlined_call_operand.vmem [shape: f32[8,1], index: 2, kind: input, shape index: {}]   ;;  %s546_s3 = inlined_call_operand.vmem [shape: f32[2,8,512], index: 3, kind: output, shape index: {}]  }
   0x1   :  { %s508_s14 = smov 0  }
   0x2 LB: > { %s25_s15 = sadd.s32 1, %s477_s13  ;;  %p416_p0 = scmp.ge.s32.totalorder %s481_s14, 1  ;;  %s481_s14 = sphi %s508_s14, %s13_s14   ;;  %s477_s13 = sphi %s506_s13, %s548_s13   ;;  %s473_s12 = sphi %s504_s12, %s547_s12  }
   0x3   : > { %p27_p1 = scmp.ge.s32.totalorder %s25_s15, 2  ;;  %p158_p2 = scmp.lt.s32.totalorder %s481_s14, 3 }
   0x5   : > { %s550_s15 = smov (%p27_p1, %s25_s15), 0  ;;  %p159_p3 = pnand %p416_p0, %p158_p2 }
   0x6   : > { %p191_p4 = scmp.lt.s32.totalorder (!%p159_p3), %s473_s12, 1 }
   0x7   : > { %162 = sbr.rel (%p159_p3) target bundleno = 161 (0xa1), region = 32 }
   0xc   : > { %v213_v0 = vld [vmem:[%s545_s2] sm:$0xff]  ;;  %v483_v1 = vmov 0   ;;  %s552_s12 = smov (!%p191_p4, %s473_s12), 1  ;;  %vm232_vm0 = vcmask 1042432   ;;  %vm228_vm1 = vcmask 23552  }
   0xd   : > { %458 = vset.pattern.permute.xlu0 %v483_v1  ;;  %s431_s18 = sshll.u32 %s552_s12, 4  ;;  %v210_v4 = vld [vmem:[%s544_s1] sm:$0xff]  ;;  %s432_s24 = sshll.u32 %s552_s12, 5 }
   0xe   : > { %216 = vperm.xlu0 %458, %v213_v0   ;;  %s198_s21 = scalar_lea.vmem %s543_s0, %s431_s18  ;;  %s208_s27 = scalar_lea.vmem %s546_s3, %s432_s24 }
   0xf   : > { %v212_v2 = vld [vmem:[%s198_s21 + $0x8] sm:$0x77]  ;;  %v211_v3 = vld [vmem:[%s198_s21] sm:$0x77] }
  0x10   : > { %223 = vst [vmem:[#allocation1 + $0x10] ss:$2 sm:$0xff] %v212_v2 }
  0x11   : > { %221 = vst [vmem:[#allocation1] ss:$2 sm:$0xff] %v211_v3 }
  0x17   : > { %v226_v5 = vld.sshfl [vmem:[#allocation1 + $0x10] sm:$0xff pattern:$0x75316420]  ;;  %v227_v6 = vld.sshfl [vmem:[#allocation1 + $0x18] sm:$0xff pattern:$0x75316420] }
  0x18   : > { %425 = vmatpush.msk.msra.mxu2 %vm232_vm0, %v226_v5  ;;  %427 = vmatpush.msk.msra.mxu3 %vm232_vm0, %v227_v6  ;;  %v224_v7 = vld.sshfl [vmem:[#allocation1] sm:$0xff pattern:$0x75316420]  ;;  %v225_v8 = vld.sshfl [vmem:[#allocation1 + $0x8] sm:$0xff pattern:$0x75316420] }
  0x19   : > { %426 = vmatmul.msk.f32.vlgmr.msra.gmra.mxu2 %vm228_vm1, %v210_v4  ;;  %428 = vmatmul.msk.f32.vlgmr.msra.gmra.mxu3 %vm228_vm1, %v210_v4 }
  0x1a   : > { %421 = vmatpush.msk.msra.mxu0 %vm232_vm0, %v224_v7  ;;  %423 = vmatpush.msk.msra.mxu1 %vm232_vm0, %v225_v8 }
  0x1b   : > { %422 = vmatmul.msk.f32.vlgmr.msra.gmra.mxu0 %vm228_vm1, %v210_v4  ;;  %424 = vmatmul.msk.f32.vlgmr.msra.gmra.mxu1 %vm228_vm1, %v210_v4 }
  0x80   : > { %v217_v9 = vpop.permute.xlu0 %216 }
  0x98   : > { %v258_v10 = vpop.f32.mrf.mxu0  ;;  %v278_v11 = vpop.f32.mrf.mxu1 }
  0x99   : > { %v259_v12 = vadd.f32 %v258_v10, %v217_v9  ;;  %v279_v13 = vadd.f32 %v278_v11, %v217_v9 }
  0x9b   : > { %321 = vst [vmem:[%s208_s27] sm:$0xff] %v259_v12 }
  0x9c   : > { %322 = vst [vmem:[%s208_s27 + $0x8] sm:$0xff] %v279_v13  ;;  %v298_v14 = vpop.f32.mrf.mxu2  ;;  %v318_v15 = vpop.f32.mrf.mxu3 }
  0x9d   : > { %v299_v16 = vadd.f32 %v298_v14, %v217_v9  ;;  %v319_v17 = vadd.f32 %v318_v15, %v217_v9 }
  0x9f   : > { %323 = vst [vmem:[%s208_s27 + $0x10] sm:$0xff] %v299_v16 }
  0xa0   : > { %324 = vst [vmem:[%s208_s27 + $0x18] sm:$0xff] %v319_v17 }
  0xa1 PF: > { %s13_s14 = sadd.s32 1, %s481_s14   ;;  %s547_s12 = smov %s477_s13 }
  0xa2   : > { %p10_p5 = scmp.ge.s32.totalorder %s13_s14, 4   ;;  %s548_s13 = smov %s550_s15 }
  0xa4   :  { %12 = sbr.rel (!%p10_p5) target bundleno = 2 (0x2), region = 63 }

// kernel: _lambda_.9
= control target key start
LH: loop header
LB: loop body
LE: loop exit
PB: predicated region body
PF: predicated region fallthrough
CT: control target
= control target key end

     0   :  { %s886_s18 = smov 0   ;;  %s888_s19 = smov 0   ;;  %s1256_s0 = inlined_call_operand.vmem [shape: f32[2,8,256], index: 0, kind: input, shape index: {}]   ;;  %s1257_s1 = inlined_call_operand.vmem [shape: f32[2,8,256], index: 1, kind: input, shape index: {}]   ;;  %s1258_s2 = inlined_call_operand.vmem [shape: f32[1,8,8,256], index: 2, kind: input, shape index: {}]   ;;  %s1259_s3 = inlined_call_operand.vmem [shape: f32[1,8,8,256], index: 3, kind: input, shape index: {}]   ;;  %s1260_s4 = inlined_call_operand.vmem [shape: f32[2,8,256], index: 4, kind: output, shape index: {0}]   ;;  %s1261_s5 = inlined_call_operand.vmem [shape: f32[2,8,256], index: 5, kind: output, shape index: {1}]  }
   0x1   :  { %s890_s20 = smov 0  }
   0x2 LB: > { %s25_s21 = sadd.s32 1, %s850_s19  ;;  %p765_p0 = scmp.ge.s32.totalorder %s854_s20, 1  ;;  %s854_s20 = sphi %s890_s20, %s16_s20   ;;  %s850_s19 = sphi %s888_s19, %s1267_s19   ;;  %s846_s18 = sphi %s886_s18, %s1266_s18  }
   0x3   : > { %p26_p1 = scmp.ge.s32.totalorder %s25_s21, 2  ;;  %p250_p2 = scmp.lt.s32.totalorder %s854_s20, 3 }
   0x5   : > { %s1269_s21 = smov (%p26_p1, %s25_s21), 0  ;;  %p251_p3 = pnand %p765_p0, %p250_p2 }
   0x6   : > { %p315_p4 = scmp.lt.s32.totalorder (!%p251_p3), %s846_s18, 1 }
   0x7   : > { %254 = sbr.rel (%p251_p3) target bundleno = 72 (0x48), region = 36 }
   0xc   : > { %s1271_s18 = smov (!%p315_p4, %s846_s18), 1  ;;  %v368_v0 = vld [vmem:[%s1258_s2] sm:$0xff]  ;;  %v774_v9 = vld [vmem:[%s1258_s2 + $0x10] sm:$0xff]  ;;  %v369_v16 = vld [vmem:[%s1258_s2 + $0x8] sm:$0xff] }
   0xd   : > { %s904_s22 = sshll.u32 %s1271_s18, 4  ;;  %v370_v3 = vld [vmem:[%s1259_s3] sm:$0xff]  ;;  %v937_v10 = vld [vmem:[%s1259_s3 + $0x10] sm:$0xff]  ;;  %v371_v17 = vld [vmem:[%s1259_s3 + $0x8] sm:$0xff] }
   0xe   : > { %s322_s25 = scalar_lea.vmem %s1256_s0, %s904_s22  ;;  %s332_s28 = scalar_lea.vmem %s1257_s1, %s904_s22  ;;  %v954_v21 = vld [vmem:[%s1258_s2 + $0x20] sm:$0xff]  ;;  %v775_v25 = vld [vmem:[%s1258_s2 + $0x18] sm:$0xff]  ;;  %v974_v32 = vld [vmem:[%s1258_s2 + $0x30] sm:$0xff] }
   0xf   : > { %v917_v1 = vld [vmem:[%s322_s25] sm:$0xff]  ;;  %v924_v4 = vld [vmem:[%s322_s25 + $0x8] sm:$0xff]  ;;  %v982_v35 = vld [vmem:[%s1259_s3 + $0x18] sm:$0xff]  ;;  %s1196_s30 = scalar_lea.vmem %s1260_s4, %s904_s22  ;;  %s362_s10 = scalar_lea.vmem %s1261_s5, %s904_s22 }
  0x10   : > { %v919_v2 = vld [vmem:[%s332_s28] sm:$0xff]  ;;  %v926_v5 = vld [vmem:[%s332_s28 + $0x8] sm:$0xff]  ;;  %v372_v6 = vperm.slane %v917_v1, 0  ;;  %v394_v8 = vperm.slane %v917_v1, 1  ;;  %v373_v14 = vperm.slane %v924_v4, 0  ;;  %v395_v22 = vperm.slane %v924_v4, 1 }
  0x11   : > { %v376_v7 = vperm.slane %v919_v2, 0  ;;  %v400_v13 = vperm.slane %v919_v2, 1  ;;  %v377_v15 = vperm.slane %v926_v5, 0  ;;  %v960_v23 = vld [vmem:[%s1259_s3 + $0x20] sm:$0xff]  ;;  %v420_v24 = vperm.slane %v917_v1, 2  ;;  %v991_v40 = vld [vmem:[%s1259_s3 + $0x30] sm:$0xff] }
  0x12   : > { %v374_v11 = vmul.f32 %v372_v6, %v368_v0  ;;  %v396_v19 = vmul.f32 %v774_v9, %v394_v8  ;;  %v426_v27 = vperm.slane %v919_v2, 2  ;;  %v446_v28 = vperm.slane %v917_v1, 3  ;;  %v1001_v45 = vld [vmem:[%s1258_s2 + $0x28] sm:$0xff]  ;;  %v1008_v48 = vld [vmem:[%s1258_s2 + $0x40] sm:$0xff]  ;;  %v1031_v58 = vld [vmem:[%s1258_s2 + $0x50] sm:$0xff] }
  0x13   : > { %v378_v12 = vmul.f32 %v376_v7, %v370_v3  ;;  %v402_v20 = vmul.f32 %v937_v10, %v400_v13  ;;  %v375_v29 = vmul.f32 %v373_v14, %v369_v16  ;;  %v379_v30 = vmul.f32 %v377_v15, %v371_v17  ;;  %v1019_v54 = vld [vmem:[%s1259_s3 + $0x40] sm:$0xff]  ;;  %v1025_v56 = vld [vmem:[%s1259_s3 + $0x28] sm:$0xff] }
  0x14   : > { %v422_v31 = vmul.f32 %v954_v21, %v420_v24  ;;  %v428_v34 = vmul.f32 %v960_v23, %v426_v27  ;;  %v382_v36 = vmul.f32 %v376_v7, %v368_v0  ;;  %v397_v37 = vmul.f32 %v775_v25, %v395_v22 }
  0x15   : > { %v380_v18 = vsub.f32 %v374_v11, %v378_v12  ;;  %v401_v38 = vperm.slane %v926_v5, 1  ;;  %v421_v39 = vperm.slane %v924_v4, 2  ;;  %v448_v42 = vmul.f32 %v974_v32, %v446_v28 }
  0x16   : > { %v452_v43 = vperm.slane %v919_v2, 3  ;;  %v472_v44 = vperm.slane %v917_v1, 4  ;;  %v1003_v46 = vmul.f32 %v377_v15, %v369_v16  ;;  %v384_v47 = vmul.f32 %v372_v6, %v370_v3  ;;  %v1043_v3 = vld [vmem:[%s1258_s2 + $0x38] sm:$0xff] }
  0x17   : > { %v398_v26 = vadd.f32 %v396_v19, %v380_v18  ;;  %v381_v49 = vsub.f32 %v375_v29, %v379_v30  ;;  %v403_v50 = vmul.f32 %v982_v35, %v401_v38  ;;  %v1011_v51 = vmul.f32 %v373_v14, %v371_v17  ;;  %v1067_v18 = vld [vmem:[%s1259_s3 + $0x38] sm:$0xff]  ;;  %v1072_v19 = vld [vmem:[%s1258_s2 + $0x60] sm:$0xff] }
  0x18   : > { %v454_v53 = vmul.f32 %v991_v40, %v452_v43  ;;  %v498_v55 = vperm.slane %v917_v1, 5  ;;  %v478_v57 = vperm.slane %v919_v2, 4  ;;  %v423_v60 = vmul.f32 %v1001_v45, %v421_v39 }
  0x19   : > { %v404_v33 = vsub.f32 %v398_v26, %v402_v20  ;;  %v399_v59 = vadd.f32 %v397_v37, %v381_v49  ;;  %v427_v61 = vperm.slane %v926_v5, 2  ;;  %v406_v62 = vmul.f32 %v774_v9, %v400_v13  ;;  %v1054_v9 = vld [vmem:[%s1259_s3 + $0x50] sm:$0xff]  ;;  %v1087_v37 = vld [vmem:[%s1258_s2 + $0x48] sm:$0xff] }
  0x1a   : > { %v474_v0 = vmul.f32 %v1008_v48, %v472_v44  ;;  %v447_v6 = vperm.slane %v924_v4, 3  ;;  %v1046_v7 = vmul.f32 %v775_v25, %v401_v38  ;;  %v480_v11 = vmul.f32 %v1019_v54, %v478_v57  ;;  %v1092_v38 = vld [vmem:[%s1259_s3 + $0x60] sm:$0xff] }
  0x1b   : > { %v424_v41 = vadd.f32 %v422_v31, %v404_v33  ;;  %v405_v12 = vsub.f32 %v399_v59, %v403_v50  ;;  %v429_v13 = vmul.f32 %v1025_v56, %v427_v61  ;;  %v500_v15 = vmul.f32 %v1031_v58, %v498_v55 }
  0x1c   : > { %v504_v16 = vperm.slane %v919_v2, 5  ;;  %v1262_v17 = vperm.slane %v917_v1, 6  ;;  %v449_v25 = vmul.f32 %v1043_v3, %v447_v6  ;;  %v453_v26 = vperm.slane %v926_v5, 3 }
  0x1d   : > { %v430_v52 = vsub.f32 %v424_v41, %v428_v34  ;;  %v425_v20 = vadd.f32 %v423_v60, %v405_v12  ;;  %v473_v29 = vperm.slane %v924_v4, 4  ;;  %v530_v33 = vperm.slane %v919_v2, 6  ;;  %v1097_v41 = vld [vmem:[%s1258_s2 + $0x70] sm:$0xff]  ;;  %v1109_v60 = vld [vmem:[%s1259_s3 + $0x48] sm:$0xff] }
  0x1e   : > { %v506_v31 = vmul.f32 %v1054_v9, %v504_v16  ;;  %v1263_v34 = vperm.slane %v917_v1, 7  ;;  %v455_v50 = vmul.f32 %v1067_v18, %v453_v26  ;;  %v526_v59 = vmul.f32 %v1072_v19, %v1262_v17  ;;  %v1116_v12 = vld [vmem:[%s1259_s3 + $0x70] sm:$0xff] }
  0x1f   : > { %v450_v63 = vadd.f32 %v448_v42, %v430_v52  ;;  %v556_v42 = vperm.slane %v919_v2, 7  ;;  %v431_v49 = vsub.f32 %v425_v20, %v429_v13  ;;  %v386_v52 = vadd.f32 %v384_v47, %v382_v36 }
  0x20   : > { %v475_v47 = vmul.f32 %v1087_v37, %v473_v29 }
  0x21   : > { %v456_v14 = vsub.f32 %v450_v63, %v454_v53  ;;  %v479_v63 = vperm.slane %v926_v5, 4  ;;  %v451_v36 = vadd.f32 %v449_v25, %v431_v49  ;;  %v408_v13 = vadd.f32 %v406_v62, %v386_v52 }
  0x22   : > { %v552_v25 = vmul.f32 %v1097_v41, %v1263_v34  ;;  %v432_v49 = vmul.f32 %v954_v21, %v426_v27  ;;  %v558_v21 = vmul.f32 %v1116_v12, %v556_v42 }
  0x23   : > { %v476_v30 = vadd.f32 %v474_v0, %v456_v14  ;;  %v499_v0 = vperm.slane %v924_v4, 5  ;;  %v410_v14 = vmul.f32 %v937_v10, %v394_v8  ;;  %v457_v17 = vsub.f32 %v451_v36, %v455_v50  ;;  %v1144_v8 = vld [vmem:[%s1259_s3 + $0x58] sm:$0xff] }
  0x24   : > { %v481_v62 = vmul.f32 %v1109_v60, %v479_v63  ;;  %v505_v50 = vperm.slane %v926_v5, 5  ;;  %v525_v36 = vperm.slane %v924_v4, 6 }
  0x25   : > { %v482_v53 = vsub.f32 %v476_v30, %v480_v11  ;;  %v1124_v11 = vld [vmem:[%s1258_s2 + $0x58] sm:$0xff]  ;;  %v532_v30 = vmul.f32 %v1092_v38, %v530_v33  ;;  %v412_v10 = vadd.f32 %v410_v14, %v408_v13  ;;  %v458_v13 = vmul.f32 %v974_v32, %v452_v43 }
  0x26   : > { %v501_v27 = vmul.f32 %v1124_v11, %v499_v0  ;;  %v531_v14 = vperm.slane %v926_v5, 6  ;;  %v411_v32 = vmul.f32 %v982_v35, %v395_v22  ;;  %v484_v22 = vmul.f32 %v1008_v48, %v478_v57 }
  0x27   : > { %v502_v20 = vadd.f32 %v500_v15, %v482_v53  ;;  %v436_v15 = vmul.f32 %v960_v23, %v420_v24  ;;  %v477_v53 = vadd.f32 %v475_v47, %v457_v17  ;;  %v434_v34 = vadd.f32 %v432_v49, %v412_v10 }
  0x28   : > { %v507_v24 = vmul.f32 %v1144_v8, %v505_v50  ;;  %v462_v49 = vmul.f32 %v991_v40, %v446_v28  ;;  %v551_v10 = vperm.slane %v924_v4, 7  ;;  %v488_v48 = vmul.f32 %v1019_v54, %v472_v44 }
  0x29   : > { %v508_v52 = vsub.f32 %v502_v20, %v506_v31  ;;  %v795_v31 = vld [vmem:[%s1258_s2 + $0x68] sm:$0xff]  ;;  %v387_v20 = vadd.f32 %v1011_v51, %v1003_v46  ;;  %v483_v17 = vsub.f32 %v477_v53, %v481_v62  ;;  %v438_v47 = vadd.f32 %v436_v15, %v434_v34 }
  0x2a   : > { %v433_v51 = vmul.f32 %v1001_v45, %v427_v61  ;;  %v527_v28 = vmul.f32 %v795_v31, %v525_v36  ;;  %v463_v54 = vmul.f32 %v1067_v18, %v447_v6  ;;  %v489_v18 = vmul.f32 %v1109_v60, %v473_v29 }
  0x2b   : > { %v528_v23 = vadd.f32 %v526_v59, %v508_v52  ;;  %v797_v59 = vld [vmem:[%s1259_s3 + $0x68] sm:$0xff]  ;;  %v409_v46 = vadd.f32 %v1046_v7, %v387_v20  ;;  %v503_v34 = vadd.f32 %v501_v27, %v483_v17  ;;  %v460_v40 = vadd.f32 %v458_v13, %v438_v47 }
  0x2c   : > { %v437_v7 = vmul.f32 %v1025_v56, %v421_v39  ;;  %v533_v61 = vmul.f32 %v797_v59, %v531_v14  ;;  %v557_v39 = vperm.slane %v926_v5, 7  ;;  %v459_v52 = vmul.f32 %v1043_v3, %v453_v26 }
  0x2d   : > { %v534_v43 = vsub.f32 %v528_v23, %v532_v30  ;;  %v799_v30 = vld [vmem:[%s1258_s2 + $0x78] sm:$0xff]  ;;  %v413_v62 = vadd.f32 %v411_v32, %v409_v46  ;;  %v509_v45 = vsub.f32 %v503_v34, %v507_v24  ;;  %v464_v15 = vadd.f32 %v462_v49, %v460_v40 }
  0x2e   : > { %v553_v53 = vmul.f32 %v799_v30, %v551_v10  ;;  %v510_v23 = vmul.f32 %v1031_v58, %v504_v16  ;;  %v514_v3 = vmul.f32 %v1054_v9, %v498_v55  ;;  %v485_v17 = vmul.f32 %v1087_v37, %v479_v63 }
  0x2f   : > { %v554_v35 = vadd.f32 %v552_v25, %v534_v43  ;;  %v801_v25 = vld [vmem:[%s1259_s3 + $0x78] sm:$0xff]  ;;  %v435_v56 = vadd.f32 %v433_v51, %v413_v62  ;;  %v529_v27 = vadd.f32 %v527_v28, %v509_v45  ;;  %v486_v13 = vadd.f32 %v484_v22, %v464_v15 }
  0x30   : > { %v559_v24 = vmul.f32 %v801_v25, %v557_v39  ;;  %v536_v47 = vmul.f32 %v1072_v19, %v530_v33  ;;  %v1264_v55 = vperm.slane %v917_v1, 6  ;;  %v511_v37 = vmul.f32 %v1124_v11, %v505_v50 }
  0x31   : > { %v560_v57 = vsub.f32 %v554_v35, %v558_v21  ;;  %v439_v44 = vadd.f32 %v437_v7, %v435_v56  ;;  %v535_v21 = vsub.f32 %v529_v27, %v533_v61  ;;  %v490_v20 = vadd.f32 %v488_v48, %v486_v13 }
  0x32   : > { %v540_v5 = vmul.f32 %v1092_v38, %v1264_v55  ;;  %v562_v19 = vmul.f32 %v1097_v41, %v556_v42  ;;  %v515_v29 = vmul.f32 %v1144_v8, %v499_v0  ;;  %v1265_v43 = vperm.slane %v917_v1, 7 }
  0x33   : > { %570 = vst [vmem:[%s1196_s30] sm:$0xff] %v560_v57  ;;  %v461_v26 = vadd.f32 %v459_v52, %v439_v44  ;;  %v555_v58 = vadd.f32 %v553_v53, %v535_v21  ;;  %v512_v16 = vadd.f32 %v510_v23, %v490_v20  ;;  %v537_v51 = vmul.f32 %v795_v31, %v531_v14 }
  0x34   : > { %v566_v46 = vmul.f32 %v1116_v12, %v1265_v43  ;;  %v541_v41 = vmul.f32 %v797_v59, %v525_v36  ;;  %v563_v50 = vmul.f32 %v799_v30, %v557_v39  ;;  %v567_v8 = vmul.f32 %v801_v25, %v551_v10 }
  0x35   : > { %v465_v6 = vadd.f32 %v463_v54, %v461_v26  ;;  %v561_v49 = vsub.f32 %v555_v58, %v559_v24  ;;  %v516_v32 = vadd.f32 %v514_v3, %v512_v16 }
  0x37   : > { %v487_v9 = vadd.f32 %v485_v17, %v465_v6  ;;  %571 = vst [vmem:[%s1196_s30 + $0x8] sm:$0xff] %v561_v49  ;;  %v538_v63 = vadd.f32 %v536_v47, %v516_v32 }
  0x39   : > { %v491_v33 = vadd.f32 %v489_v18, %v487_v9  ;;  %v542_v60 = vadd.f32 %v540_v5, %v538_v63 }
  0x3b   : > { %v513_v38 = vadd.f32 %v511_v37, %v491_v33  ;;  %v564_v34 = vadd.f32 %v562_v19, %v542_v60 }
  0x3d   : > { %v517_v2 = vadd.f32 %v515_v29, %v513_v38  ;;  %v568_v42 = vadd.f32 %v566_v46, %v564_v34 }
  0x3f   : > { %v539_v11 = vadd.f32 %v537_v51, %v517_v2  ;;  %572 = vst [vmem:[%s362_s10] sm:$0xff] %v568_v42 }
  0x41   : > { %v543_v0 = vadd.f32 %v541_v41, %v539_v11 }
  0x43   : > { %v565_v1 = vadd.f32 %v563_v50, %v543_v0 }
  0x45   : > { %v569_v28 = vadd.f32 %v567_v8, %v565_v1 }
  0x47   : > { %573 = vst [vmem:[%s362_s10 + $0x8] sm:$0xff] %v569_v28 }
  0x48 PF: > { %s16_s20 = sadd.s32 1, %s854_s20   ;;  %s1266_s18 = smov %s850_s19 }
  0x49   : > { %p13_p5 = scmp.ge.s32.totalorder %s16_s20, 4   ;;  %s1267_s19 = smov %s1269_s21 }
  0x4b   :  { %15 = sbr.rel (!%p13_p5) target bundleno = 2 (0x2), region = 101 }

// kernel: reverse.6
= control target key start
LH: loop header
LB: loop body
LE: loop exit
PB: predicated region body
PF: predicated region fallthrough
CT: control target
= control target key end

     0   :  { %s584_s0 = inlined_call_operand.vmem [shape: f32[2,8,8,8,3], index: 0, kind: input, shape index: {}]   ;;  %s585_s1 = inlined_call_operand.vmem [shape: f32[2,8,8,8,3], index: 1, kind: output, shape index: {}]  }
   0x1   :  { %v192_v0 = vld [vmem:[%s584_s0 + $0x10] sm:$0xff]  ;;  %v195_v2 = vld [vmem:[%s584_s0 + $0x28] sm:$0xff]  ;;  %v199_v4 = vld [vmem:[%s584_s0 + $0x40] sm:$0xff] }
   0x2   :  { %v193_v1 = vld [vmem:[%s584_s0 + $0xd0] sm:$0xff]  ;;  %4 = vst [vmem:[%s585_s1] sm:$0xff] %v192_v0  ;;  %v197_v3 = vld [vmem:[%s584_s0 + $0xe8] sm:$0xff]  ;;  %v201_v5 = vld [vmem:[%s584_s0 + $0x100] sm:$0xff] }
   0x3   :  { %194 = vst [vmem:[%s585_s1 + $0xc0] sm:$0xff] %v193_v1  ;;  %v203_v6 = vld [vmem:[%s584_s0 + $0x58] sm:$0xff]  ;;  %v207_v8 = vld [vmem:[%s584_s0 + $0x70] sm:$0xff]  ;;  %v211_v10 = vld [vmem:[%s584_s0 + $0x88] sm:$0xff] }
   0x4   :  { %196 = vst [vmem:[%s585_s1 + $0x18] sm:$0xff] %v195_v2  ;;  %v205_v7 = vld [vmem:[%s584_s0 + $0x118] sm:$0xff]  ;;  %v209_v9 = vld [vmem:[%s584_s0 + $0x130] sm:$0xff]  ;;  %v213_v11 = vld [vmem:[%s584_s0 + $0x148] sm:$0xff] }
   0x5   :  { %198 = vst [vmem:[%s585_s1 + $0xd8] sm:$0xff] %v197_v3  ;;  %v215_v12 = vld [vmem:[%s584_s0 + $0xa0] sm:$0xff]  ;;  %v219_v14 = vld [vmem:[%s584_s0 + $0xb8] sm:$0xff]  ;;  %v223_v16 = vld [vmem:[%s584_s0 + $0x8] sm:$0xff] }
   0x6   :  { %200 = vst [vmem:[%s585_s1 + $0x30] sm:$0xff] %v199_v4  ;;  %v217_v13 = vld [vmem:[%s584_s0 + $0x160] sm:$0xff]  ;;  %v221_v15 = vld [vmem:[%s584_s0 + $0x178] sm:$0xff]  ;;  %v225_v17 = vld [vmem:[%s584_s0 + $0xc8] sm:$0xff] }
   0x7   :  { %202 = vst [vmem:[%s585_s1 + $0xf0] sm:$0xff] %v201_v5  ;;  %v227_v18 = vld [vmem:[%s584_s0 + $0x20] sm:$0xff]  ;;  %v231_v20 = vld [vmem:[%s584_s0 + $0x38] sm:$0xff]  ;;  %v235_v22 = vld [vmem:[%s584_s0 + $0x50] sm:$0xff] }
   0x8   :  { %204 = vst [vmem:[%s585_s1 + $0x48] sm:$0xff] %v203_v6  ;;  %v229_v19 = vld [vmem:[%s584_s0 + $0xe0] sm:$0xff]  ;;  %v233_v21 = vld [vmem:[%s584_s0 + $0xf8] sm:$0xff]  ;;  %v237_v23 = vld [vmem:[%s584_s0 + $0x110] sm:$0xff] }
   0x9   :  { %206 = vst [vmem:[%s585_s1 + $0x108] sm:$0xff] %v205_v7  ;;  %v239_v24 = vld [vmem:[%s584_s0 + $0x68] sm:$0xff]  ;;  %v243_v26 = vld [vmem:[%s584_s0 + $0x80] sm:$0xff]  ;;  %v247_v28 = vld [vmem:[%s584_s0 + $0x98] sm:$0xff] }
   0xa   :  { %208 = vst [vmem:[%s585_s1 + $0x60] sm:$0xff] %v207_v8  ;;  %v241_v25 = vld [vmem:[%s584_s0 + $0x128] sm:$0xff]  ;;  %v245_v27 = vld [vmem:[%s584_s0 + $0x140] sm:$0xff]  ;;  %v249_v29 = vld [vmem:[%s584_s0 + $0x158] sm:$0xff] }
   0xb   :  { %210 = vst [vmem:[%s585_s1 + $0x120] sm:$0xff] %v209_v9  ;;  %v251_v30 = vld [vmem:[%s584_s0 + $0xb0] sm:$0xff]  ;;  %v129_v32 = vld [vmem:[%s584_s0] sm:$0xff]  ;;  %v258_v34 = vld [vmem:[%s584_s0 + $0x18] sm:$0xff] }
   0xc   :  { %212 = vst [vmem:[%s585_s1 + $0x78] sm:$0xff] %v211_v10  ;;  %v253_v31 = vld [vmem:[%s584_s0 + $0x170] sm:$0xff]  ;;  %v256_v33 = vld [vmem:[%s584_s0 + $0xc0] sm:$0xff]  ;;  %v260_v35 = vld [vmem:[%s584_s0 + $0xd8] sm:$0xff] }
   0xd   :  { %214 = vst [vmem:[%s585_s1 + $0x138] sm:$0xff] %v213_v11  ;;  %v262_v36 = vld [vmem:[%s584_s0 + $0x30] sm:$0xff]  ;;  %v266_v38 = vld [vmem:[%s584_s0 + $0x48] sm:$0xff]  ;;  %v270_v40 = vld [vmem:[%s584_s0 + $0x60] sm:$0xff] }
   0xe   :  { %216 = vst [vmem:[%s585_s1 + $0x90] sm:$0xff] %v215_v12  ;;  %v264_v37 = vld [vmem:[%s584_s0 + $0xf0] sm:$0xff]  ;;  %v268_v39 = vld [vmem:[%s584_s0 + $0x108] sm:$0xff]  ;;  %v272_v41 = vld [vmem:[%s584_s0 + $0x120] sm:$0xff] }
   0xf   :  { %218 = vst [vmem:[%s585_s1 + $0x150] sm:$0xff] %v217_v13  ;;  %v274_v42 = vld [vmem:[%s584_s0 + $0x78] sm:$0xff]  ;;  %v278_v44 = vld [vmem:[%s584_s0 + $0x90] sm:$0xff]  ;;  %v282_v46 = vld [vmem:[%s584_s0 + $0xa8] sm:$0xff] }
  0x10   :  { %220 = vst [vmem:[%s585_s1 + $0xa8] sm:$0xff] %v219_v14  ;;  %v276_v43 = vld [vmem:[%s584_s0 + $0x138] sm:$0xff]  ;;  %v280_v45 = vld [vmem:[%s584_s0 + $0x150] sm:$0xff]  ;;  %v284_v47 = vld [vmem:[%s584_s0 + $0x168] sm:$0xff] }
  0x11   :  { %222 = vst [vmem:[%s585_s1 + $0x168] sm:$0xff] %v221_v15 }
  0x12   :  { %224 = vst [vmem:[%s585_s1 + $0x8] sm:$0xff] %v223_v16 }
  0x13   :  { %226 = vst [vmem:[%s585_s1 + $0xc8] sm:$0xff] %v225_v17 }
  0x14   :  { %228 = vst [vmem:[%s585_s1 + $0x20] sm:$0xff] %v227_v18 }
  0x15   :  { %230 = vst [vmem:[%s585_s1 + $0xe0] sm:$0xff] %v229_v19 }
  0x16   :  { %232 = vst [vmem:[%s585_s1 + $0x38] sm:$0xff] %v231_v20 }
  0x17   :  { %234 = vst [vmem:[%s585_s1 + $0xf8] sm:$0xff] %v233_v21 }
  0x18   :  { %236 = vst [vmem:[%s585_s1 + $0x50] sm:$0xff] %v235_v22 }
  0x19   :  { %238 = vst [vmem:[%s585_s1 + $0x110] sm:$0xff] %v237_v23 }
  0x1a   :  { %240 = vst [vmem:[%s585_s1 + $0x68] sm:$0xff] %v239_v24 }
  0x1b   :  { %242 = vst [vmem:[%s585_s1 + $0x128] sm:$0xff] %v241_v25 }
  0x1c   :  { %244 = vst [vmem:[%s585_s1 + $0x80] sm:$0xff] %v243_v26 }
  0x1d   :  { %246 = vst [vmem:[%s585_s1 + $0x140] sm:$0xff] %v245_v27 }
  0x1e   :  { %248 = vst [vmem:[%s585_s1 + $0x98] sm:$0xff] %v247_v28 }
  0x1f   :  { %250 = vst [vmem:[%s585_s1 + $0x158] sm:$0xff] %v249_v29 }
  0x20   :  { %252 = vst [vmem:[%s585_s1 + $0xb0] sm:$0xff] %v251_v30 }
  0x21   :  { %254 = vst [vmem:[%s585_s1 + $0x170] sm:$0xff] %v253_v31 }
  0x22   :  { %255 = vst [vmem:[%s585_s1 + $0x10] sm:$0xff] %v129_v32 }
  0x23   :  { %257 = vst [vmem:[%s585_s1 + $0xd0] sm:$0xff] %v256_v33 }
  0x24   :  { %259 = vst [vmem:[%s585_s1 + $0x28] sm:$0xff] %v258_v34 }
  0x25   :  { %261 = vst [vmem:[%s585_s1 + $0xe8] sm:$0xff] %v260_v35 }
  0x26   :  { %263 = vst [vmem:[%s585_s1 + $0x40] sm:$0xff] %v262_v36 }
  0x27   :  { %265 = vst [vmem:[%s585_s1 + $0x100] sm:$0xff] %v264_v37 }
  0x28   :  { %267 = vst [vmem:[%s585_s1 + $0x58] sm:$0xff] %v266_v38 }
  0x29   :  { %269 = vst [vmem:[%s585_s1 + $0x118] sm:$0xff] %v268_v39 }
  0x2a   :  { %271 = vst [vmem:[%s585_s1 + $0x70] sm:$0xff] %v270_v40 }
  0x2b   :  { %273 = vst [vmem:[%s585_s1 + $0x130] sm:$0xff] %v272_v41 }
  0x2c   :  { %275 = vst [vmem:[%s585_s1 + $0x88] sm:$0xff] %v274_v42 }
  0x2d   :  { %277 = vst [vmem:[%s585_s1 + $0x148] sm:$0xff] %v276_v43 }
  0x2e   :  { %279 = vst [vmem:[%s585_s1 + $0xa0] sm:$0xff] %v278_v44 }
  0x2f   :  { %281 = vst [vmem:[%s585_s1 + $0x160] sm:$0xff] %v280_v45 }
  0x30   :  { %283 = vst [vmem:[%s585_s1 + $0xb8] sm:$0xff] %v282_v46 }
  0x31   :  { %285 = vst [vmem:[%s585_s1 + $0x178] sm:$0xff] %v284_v47 }

// kernel: _lambda_.10
= control target key start
LH: loop header
LB: loop body
LE: loop exit
PB: predicated region body
PF: predicated region fallthrough
CT: control target
= control target key end

     0   :  { %s593_s15 = smov 0   ;;  %s595_s16 = smov 0   ;;  %s640_s0 = inlined_call_operand.vmem [shape: f32[2,8,512], index: 0, kind: input, shape index: {}]   ;;  %s641_s1 = inlined_call_operand.vmem [shape: f32[8,8], index: 1, kind: input, shape index: {}]   ;;  %s642_s2 = inlined_call_operand.vmem [shape: f32[8,1], index: 2, kind: input, shape index: {}]   ;;  %s643_s3 = inlined_call_operand.vmem [shape: f32[2,8,512], index: 3, kind: input, shape index: {}]   ;;  %s644_s4 = inlined_call_operand.vmem [shape: f32[2,8,512], index: 4, kind: output, shape index: {}]  }
   0x1   :  { %s597_s17 = smov 0  }
   0x2 LB: > { %s26_s18 = sadd.s32 1, %s561_s16  ;;  %p493_p0 = scmp.ge.s32.totalorder %s565_s17, 1  ;;  %s565_s17 = sphi %s597_s17, %s14_s17   ;;  %s561_s16 = sphi %s595_s16, %s646_s16   ;;  %s557_s15 = sphi %s593_s15, %s645_s15  }
   0x3   : > { %p28_p1 = scmp.ge.s32.totalorder %s26_s18, 2  ;;  %p200_p2 = scmp.lt.s32.totalorder %s565_s17, 3 }
   0x5   : > { %s648_s18 = smov (%p28_p1, %s26_s18), 0  ;;  %p201_p3 = pnand %p493_p0, %p200_p2 }
   0x6   : > { %p244_p4 = scmp.lt.s32.totalorder (!%p201_p3), %s557_s15, 1 }
   0x7   : > { %204 = sbr.rel (%p201_p3) target bundleno = 162 (0xa2), region = 36 }
   0xc   : > { %v278_v0 = vld [vmem:[%s642_s2] sm:$0xff]  ;;  %v567_v1 = vmov 0   ;;  %s650_s15 = smov (!%p244_p4, %s557_s15), 1  ;;  %vm284_vm0 = vcmask 64512  }
   0xd   : > { %534 = vset.pattern.permute.xlu0 %v567_v1  ;;  %s614_s21 = sshll.u32 %s650_s15, 5  ;;  %v273_v2 = vld [vmem:[%s641_s1] sm:$0xff] }
   0xe   : > { %281 = vperm.xlu0 %534, %v278_v0   ;;  %s251_s24 = scalar_lea.vmem %s640_s0, %s614_s21  ;;  %s261_s29 = scalar_lea.vmem %s643_s3, %s614_s21 }
   0xf   : > { %v276_v3 = vld [vmem:[%s251_s24 + $0x10] sm:$0xff]  ;;  %v277_v4 = vld [vmem:[%s251_s24 + $0x18] sm:$0xff]  ;;  %v274_v5 = vld [vmem:[%s251_s24] sm:$0xff]  ;;  %s271_s6 = scalar_lea.vmem %s644_s4, %s614_s21 }
  0x10   : > { %343 = vmatpush.msra.mxu2 %v276_v3  ;;  %363 = vmatpush.msra.mxu3 %v277_v4  ;;  %v275_v6 = vld [vmem:[%s251_s24 + $0x8] sm:$0xff]  ;;  %v368_v9 = vld [vmem:[%s261_s29] sm:$0xff]  ;;  %v370_v17 = vld [vmem:[%s261_s29 + $0x10] sm:$0xff] }
  0x11   : > { %502 = vmatmul.msk.f32.vlgmr.msra.gmra.mxu2 %vm284_vm0, %v273_v2  ;;  %503 = vmatmul.msk.f32.vlgmr.msra.gmra.mxu3 %vm284_vm0, %v273_v2  ;;  %v369_v11 = vld [vmem:[%s261_s29 + $0x8] sm:$0xff]  ;;  %v371_v19 = vld [vmem:[%s261_s29 + $0x18] sm:$0xff] }
  0x12   : > { %303 = vmatpush.msra.mxu0 %v274_v5  ;;  %323 = vmatpush.msra.mxu1 %v275_v6 }
  0x13   : > { %500 = vmatmul.msk.f32.vlgmr.msra.gmra.mxu0 %vm284_vm0, %v273_v2  ;;  %501 = vmatmul.msk.f32.vlgmr.msra.gmra.mxu1 %vm284_vm0, %v273_v2 }
  0x80   : > { %v282_v7 = vpop.permute.xlu0 %281 }
  0x90   : > { %v305_v8 = vpop.f32.mrf.mxu0  ;;  %v325_v10 = vpop.f32.mrf.mxu1 }
  0x91   : > { %v306_v12 = vadd.f32 %v305_v8, %v282_v7  ;;  %v326_v13 = vadd.f32 %v325_v10, %v282_v7 }
  0x93   : > { %v372_v14 = vadd.f32 %v368_v9, %v306_v12  ;;  %v373_v15 = vadd.f32 %v369_v11, %v326_v13 }
  0x94   : > { %v345_v16 = vpop.f32.mrf.mxu2  ;;  %v365_v18 = vpop.f32.mrf.mxu3 }
  0x95   : > { %535 = vtanh.f32 %v372_v14  ;;  %v346_v20 = vadd.f32 %v345_v16, %v282_v7  ;;  %v366_v21 = vadd.f32 %v365_v18, %v282_v7 }
  0x96   : > { %537 = vtanh.f32 %v373_v15 }
  0x97   : > { %v374_v22 = vadd.f32 %v370_v17, %v346_v20  ;;  %v375_v23 = vadd.f32 %v371_v19, %v366_v21 }
  0x99   : > { %539 = vtanh.f32 %v374_v22 }
  0x9a   : > { %541 = vtanh.f32 %v375_v23 }
  0x9b   : > { %v536_v24 = vpop.eup %535 }
  0x9c   : > { %v538_v25 = vpop.eup %537  ;;  %380 = vst [vmem:[%s271_s6] sm:$0xff] %v536_v24 }
  0x9d   : > { %381 = vst [vmem:[%s271_s6 + $0x8] sm:$0xff] %v538_v25 }
  0x9f   : > { %v540_v26 = vpop.eup %539 }
  0xa0   : > { %v542_v27 = vpop.eup %541  ;;  %382 = vst [vmem:[%s271_s6 + $0x10] sm:$0xff] %v540_v26 }
  0xa1   : > { %383 = vst [vmem:[%s271_s6 + $0x18] sm:$0xff] %v542_v27 }
  0xa2 PF: > { %s14_s17 = sadd.s32 1, %s565_s17   ;;  %s645_s15 = smov %s561_s16 }
  0xa3   : > { %p11_p5 = scmp.ge.s32.totalorder %s14_s17, 4   ;;  %s646_s16 = smov %s648_s18 }
  0xa5   :  { %13 = sbr.rel (!%p11_p5) target bundleno = 2 (0x2), region = 69 }

// kernel: _lambda_.14
= control target key start
LH: loop header
LB: loop body
LE: loop exit
PB: predicated region body
PF: predicated region fallthrough
CT: control target
= control target key end

     0   :  { %s581_s15 = smov 0   ;;  %s583_s16 = smov 0   ;;  %s623_s0 = inlined_call_operand.vmem [shape: f32[2,8,512], index: 0, kind: input, shape index: {}]   ;;  %s624_s1 = inlined_call_operand.vmem [shape: f32[8,8], index: 1, kind: input, shape index: {}]   ;;  %s625_s2 = inlined_call_operand.vmem [shape: f32[8,1], index: 2, kind: input, shape index: {}]   ;;  %s626_s3 = inlined_call_operand.vmem [shape: f32[2,8,512], index: 3, kind: input, shape index: {}]   ;;  %s627_s4 = inlined_call_operand.vmem [shape: f32[2,8,512], index: 4, kind: output, shape index: {}]  }
   0x1   :  { %s585_s17 = smov 0  }
   0x2 LB: > { %s26_s18 = sadd.s32 1, %s549_s16  ;;  %p489_p0 = scmp.ge.s32.totalorder %s553_s17, 1  ;;  %s553_s17 = sphi %s585_s17, %s14_s17   ;;  %s549_s16 = sphi %s583_s16, %s629_s16   ;;  %s545_s15 = sphi %s581_s15, %s628_s15  }
   0x3   : > { %p28_p1 = scmp.ge.s32.totalorder %s26_s18, 2  ;;  %p200_p2 = scmp.lt.s32.totalorder %s553_s17, 3 }
   0x5   : > { %s631_s18 = smov (%p28_p1, %s26_s18), 0  ;;  %p201_p3 = pnand %p489_p0, %p200_p2 }
   0x6   : > { %p244_p4 = scmp.lt.s32.totalorder (!%p201_p3), %s545_s15, 1 }
   0x7   : > { %204 = sbr.rel (%p201_p3) target bundleno = 155 (0x9b), region = 36 }
   0xc   : > { %v278_v0 = vld [vmem:[%s625_s2] sm:$0xff]  ;;  %v555_v1 = vmov 0   ;;  %s633_s15 = smov (!%p244_p4, %s545_s15), 1  ;;  %vm284_vm0 = vcmask 64512  }
   0xd   : > { %530 = vset.pattern.permute.xlu0 %v555_v1  ;;  %s502_s21 = sshll.u32 %s633_s15, 5  ;;  %v273_v2 = vld [vmem:[%s624_s1] sm:$0xff] }
   0xe   : > { %281 = vperm.xlu0 %530, %v278_v0   ;;  %s251_s24 = scalar_lea.vmem %s623_s0, %s502_s21  ;;  %s261_s29 = scalar_lea.vmem %s626_s3, %s502_s21 }
   0xf   : > { %v276_v3 = vld [vmem:[%s251_s24 + $0x10] sm:$0xff]  ;;  %v277_v4 = vld [vmem:[%s251_s24 + $0x18] sm:$0xff]  ;;  %v274_v5 = vld [vmem:[%s251_s24] sm:$0xff]  ;;  %s271_s6 = scalar_lea.vmem %s627_s4, %s502_s21 }
  0x10   : > { %343 = vmatpush.msra.mxu2 %v276_v3  ;;  %363 = vmatpush.msra.mxu3 %v277_v4  ;;  %v275_v6 = vld [vmem:[%s251_s24 + $0x8] sm:$0xff]  ;;  %v368_v9 = vld [vmem:[%s261_s29] sm:$0xff]  ;;  %v370_v17 = vld [vmem:[%s261_s29 + $0x10] sm:$0xff] }
  0x11   : > { %498 = vmatmul.msk.f32.vlgmr.msra.gmra.mxu2 %vm284_vm0, %v273_v2  ;;  %499 = vmatmul.msk.f32.vlgmr.msra.gmra.mxu3 %vm284_vm0, %v273_v2  ;;  %v369_v11 = vld [vmem:[%s261_s29 + $0x8] sm:$0xff]  ;;  %v371_v19 = vld [vmem:[%s261_s29 + $0x18] sm:$0xff] }
  0x12   : > { %303 = vmatpush.msra.mxu0 %v274_v5  ;;  %323 = vmatpush.msra.mxu1 %v275_v6 }
  0x13   : > { %496 = vmatmul.msk.f32.vlgmr.msra.gmra.mxu0 %vm284_vm0, %v273_v2  ;;  %497 = vmatmul.msk.f32.vlgmr.msra.gmra.mxu1 %vm284_vm0, %v273_v2 }
  0x80   : > { %v282_v7 = vpop.permute.xlu0 %281 }
  0x90   : > { %v305_v8 = vpop.f32.mrf.mxu0  ;;  %v325_v10 = vpop.f32.mrf.mxu1 }
  0x91   : > { %v306_v12 = vadd.f32 %v305_v8, %v282_v7  ;;  %v326_v13 = vadd.f32 %v325_v10, %v282_v7 }
  0x93   : > { %v372_v14 = vadd.f32 %v368_v9, %v306_v12  ;;  %v373_v15 = vadd.f32 %v369_v11, %v326_v13 }
  0x94   : > { %v345_v16 = vpop.f32.mrf.mxu2  ;;  %v365_v18 = vpop.f32.mrf.mxu3 }
  0x95   : > { %376 = vst [vmem:[%s271_s6] sm:$0xff] %v372_v14  ;;  %v346_v20 = vadd.f32 %v345_v16, %v282_v7  ;;  %v366_v21 = vadd.f32 %v365_v18, %v282_v7 }
  0x96   : > { %377 = vst [vmem:[%s271_s6 + $0x8] sm:$0xff] %v373_v15 }
  0x97   : > { %v374_v22 = vadd.f32 %v370_v17, %v346_v20  ;;  %v375_v23 = vadd.f32 %v371_v19, %v366_v21 }
  0x99   : > { %378 = vst [vmem:[%s271_s6 + $0x10] sm:$0xff] %v374_v22 }
  0x9a   : > { %379 = vst [vmem:[%s271_s6 + $0x18] sm:$0xff] %v375_v23 }
  0x9b PF: > { %s14_s17 = sadd.s32 1, %s553_s17   ;;  %s628_s15 = smov %s549_s16 }
  0x9c   : > { %p11_p5 = scmp.ge.s32.totalorder %s14_s17, 4   ;;  %s629_s16 = smov %s631_s18 }
  0x9e   :  { %13 = sbr.rel (!%p11_p5) target bundleno = 2 (0x2), region = 69 }

// kernel: _lambda_.15
= control target key start
LH: loop header
LB: loop body
LE: loop exit
PB: predicated region body
PF: predicated region fallthrough
CT: control target
= control target key end

     0   :  { %s780_s18 = smov 0   ;;  %s782_s19 = smov 0   ;;  %s863_s0 = inlined_call_operand.vmem [shape: f32[2,8,512], index: 0, kind: input, shape index: {}]   ;;  %s864_s1 = inlined_call_operand.vmem [shape: f32[32,8], index: 1, kind: input, shape index: {}]   ;;  %s865_s2 = inlined_call_operand.vmem [shape: f32[32,1], index: 2, kind: input, shape index: {}]   ;;  %s866_s3 = inlined_call_operand.vmem [shape: f32[3,32], index: 3, kind: input, shape index: {}]   ;;  %s867_s4 = inlined_call_operand.vmem [shape: f32[3,1], index: 4, kind: input, shape index: {}]   ;;  %s868_s5 = inlined_call_operand.vmem [shape: f32[2,3,512], index: 5, kind: output, shape index: {}]  }
   0x1   :  { %s784_s20 = smov 0  }
   0x2 LB: > { %s27_s21 = sadd.s32 1, %s743_s19  ;;  %p636_p0 = scmp.ge.s32.totalorder %s747_s20, 1  ;;  %s747_s20 = sphi %s784_s20, %s15_s20   ;;  %s743_s19 = sphi %s782_s19, %s870_s19   ;;  %s739_s18 = sphi %s780_s18, %s869_s18  }
   0x3   : > { %p29_p1 = scmp.ge.s32.totalorder %s27_s21, 2  ;;  %p208_p2 = scmp.lt.s32.totalorder %s747_s20, 3 }
   0x5   : > { %s872_s21 = smov (%p29_p1, %s27_s21), 0  ;;  %p209_p3 = pnand %p636_p0, %p208_p2 }
   0x6   : > { %p245_p4 = scmp.lt.s32.totalorder (!%p209_p3), %s739_s18, 1 }
   0x7   : > { %212 = sbr.rel (%p209_p3) target bundleno = 330 (0x14a), region = 40 }
   0xc   : > { %v273_v0 = vld [vmem:[%s865_s2 + $0x8] sm:$0xff]  ;;  %v749_v1 = vmov 0   ;;  %s874_s18 = smov (!%p245_p4, %s739_s18), 1  ;;  %v275_v2 = vld [vmem:[%s865_s2 + $0x18] sm:$0xff]  ;;  %v264_v3 = vld [vmem:[%s864_s1] sm:$0xff]  ;;  %vm296_vm0 = vcmask 64512  }
   0xd   : > { %691 = vset.pattern.permute.xlu1 %v749_v1  ;;  %690 = vset.pattern.permute.xlu0 %v749_v1  ;;  %s663_s26 = sshll.u32 %s874_s18, 5  ;;  %v272_v8 = vld [vmem:[%s865_s2] sm:$0xff]  ;;  %v274_v9 = vld [vmem:[%s865_s2 + $0x10] sm:$0xff]  ;;  %v265_v10 = vld [vmem:[%s864_s1 + $0x8] sm:$0xff]  ;;  %vm448_vm1 = vcmask 261120   ;;  %s664_s25 = sshll.u32 %s874_s18, 4 }
   0xe   : > { %283 = vperm.xlu1 %691, %v273_v0   ;;  %692 = vset.pattern.permute.xlu2 %v749_v1  ;;  %s252_s29 = scalar_lea.vmem %s863_s0, %s663_s26  ;;  %v266_v11 = vld [vmem:[%s864_s1 + $0x10] sm:$0xff]  ;;  %v267_v12 = vld [vmem:[%s864_s1 + $0x18] sm:$0xff]  ;;  %v442_v25 = vld [vmem:[%s867_s4] sm:$0x7]  ;;  %vm538_vm2 = vcmask 1043456   ;;  %s262_s28 = scalar_lea.vmem %s868_s5, %s664_s25 }
   0xf   : > { %293 = vperm.xlu0 %690, %v275_v2   ;;  %v268_v4 = vld [vmem:[%s252_s29] sm:$0xff]  ;;  %v269_v5 = vld [vmem:[%s252_s29 + $0x8] sm:$0xff]  ;;  %v270_v6 = vld [vmem:[%s252_s29 + $0x10] sm:$0xff]  ;;  %445 = vperm.xlu2 %692, %v442_v25  }
  0x10   : > { %324 = vmatpush.msra.mxu0 %v268_v4  ;;  %353 = vmatpush.msra.mxu1 %v269_v5  ;;  %v271_v7 = vld [vmem:[%s252_s29 + $0x18] sm:$0xff]  ;;  %v441_v61 = vld [vmem:[%s866_s3] sm:$0x7] }
  0x11   : > { %382 = vmatpush.msra.mxu2 %v270_v6  ;;  %411 = vmatpush.msra.mxu3 %v271_v7 }
  0x12   : > { %641 = vmatmul.msk.f32.vlgmr.msra.gmra.mxu0 %vm296_vm0, %v264_v3  ;;  %645 = vmatmul.msk.f32.vlgmr.msra.gmra.mxu1 %vm296_vm0, %v264_v3 }
  0x13   : > { %649 = vmatmul.msk.f32.vlgmr.msra.gmra.mxu2 %vm296_vm0, %v264_v3  ;;  %653 = vmatmul.msk.f32.vlgmr.msra.gmra.mxu3 %vm296_vm0, %v264_v3 }
  0x16   : > { %278 = vperm.xlu1 %691, %v272_v8  }
  0x17   : > { %288 = vperm.xlu0 %690, %v274_v9  }
  0x1a   : > { %642 = vmatmul.msk.f32.gmra.mxu0 %vm296_vm0, %v265_v10  ;;  %646 = vmatmul.msk.f32.gmra.mxu1 %vm296_vm0, %v265_v10 }
  0x1b   : > { %650 = vmatmul.msk.f32.gmra.mxu2 %vm296_vm0, %v265_v10  ;;  %654 = vmatmul.msk.f32.gmra.mxu3 %vm296_vm0, %v265_v10 }
  0x22   : > { %643 = vmatmul.msk.f32.gmra.mxu0 %vm296_vm0, %v266_v11  ;;  %647 = vmatmul.msk.f32.gmra.mxu1 %vm296_vm0, %v266_v11 }
  0x23   : > { %651 = vmatmul.msk.f32.gmra.mxu2 %vm296_vm0, %v266_v11  ;;  %655 = vmatmul.msk.f32.gmra.mxu3 %vm296_vm0, %v266_v11 }
  0x2a   : > { %644 = vmatmul.msk.f32.gmra.mxu0 %vm296_vm0, %v267_v12  ;;  %648 = vmatmul.msk.f32.gmra.mxu1 %vm296_vm0, %v267_v12 }
  0x2b   : > { %652 = vmatmul.msk.f32.gmra.mxu2 %vm296_vm0, %v267_v12  ;;  %656 = vmatmul.msk.f32.gmra.mxu3 %vm296_vm0, %v267_v12 }
  0x69   : > { %v446_v3 = vpop.permute.xlu2 %445 }
  0x80   : > { %v284_v19 = vpop.permute.xlu1 %283 }
  0x81   : > { %v294_v20 = vpop.permute.xlu0 %293 }
  0x88   : > { %v279_v26 = vpop.permute.xlu1 %278 }
  0x89   : > { %v289_v33 = vpop.permute.xlu0 %288 }
  0x8f   : > { %v326_v13 = vpop.f32.mrf.mxu0  ;;  %v355_v14 = vpop.f32.mrf.mxu1 }
  0x90   : > { %v327_v27 = vadd.f32 %v326_v13, %v279_v26  ;;  %v356_v28 = vadd.f32 %v355_v14, %v279_v26 }
  0x92   : > { %693 = vtanh.f32 %v327_v27 }
  0x93   : > { %695 = vtanh.f32 %v356_v28 }
  0x96   : > { %v384_v15 = vpop.f32.mrf.mxu2  ;;  %v413_v16 = vpop.f32.mrf.mxu3 }
  0x97   : > { %v329_v17 = vpop.f32.mrf.mxu0  ;;  %v358_v18 = vpop.f32.mrf.mxu1  ;;  %v385_v53 = vadd.f32 %v384_v15, %v279_v26  ;;  %v414_v55 = vadd.f32 %v413_v16, %v279_v26 }
  0x98   : > { %v330_v38 = vadd.f32 %v329_v17, %v284_v19  ;;  %v359_v39 = vadd.f32 %v358_v18, %v284_v19  ;;  %v694_v42 = vpop.eup %693 }
  0x99   : > { %v696_v46 = vpop.eup %695 }
  0x9e   : > { %v387_v21 = vpop.f32.mrf.mxu2  ;;  %v416_v22 = vpop.f32.mrf.mxu3 }
  0x9f   : > { %v332_v23 = vpop.f32.mrf.mxu0  ;;  %v361_v24 = vpop.f32.mrf.mxu1  ;;  %v388_v49 = vadd.f32 %v387_v21, %v284_v19  ;;  %v417_v51 = vadd.f32 %v416_v22, %v284_v19 }
  0xa0   : > { %v333_v36 = vadd.f32 %v332_v23, %v289_v33  ;;  %v362_v37 = vadd.f32 %v361_v24, %v289_v33 }
  0xa6   : > { %v390_v29 = vpop.f32.mrf.mxu2  ;;  %v419_v30 = vpop.f32.mrf.mxu3 }
  0xa7   : > { %v335_v31 = vpop.f32.mrf.mxu0  ;;  %v364_v32 = vpop.f32.mrf.mxu1  ;;  %v391_v43 = vadd.f32 %v390_v29, %v289_v33  ;;  %v420_v47 = vadd.f32 %v419_v30, %v289_v33 }
  0xa8   : > { %v336_v34 = vadd.f32 %v335_v31, %v294_v20  ;;  %v365_v35 = vadd.f32 %v364_v32, %v294_v20 }
  0xaa   : > { %697 = vtanh.f32 %v336_v34 }
  0xab   : > { %699 = vtanh.f32 %v365_v35 }
  0xac   : > { %701 = vtanh.f32 %v333_v36 }
  0xad   : > { %703 = vtanh.f32 %v362_v37 }
  0xae   : > { %v393_v40 = vpop.f32.mrf.mxu2  ;;  %v422_v41 = vpop.f32.mrf.mxu3  ;;  %705 = vtanh.f32 %v330_v38 }
  0xaf   : > { %v394_v44 = vadd.f32 %v393_v40, %v294_v20  ;;  %v423_v45 = vadd.f32 %v422_v41, %v294_v20  ;;  %707 = vtanh.f32 %v359_v39 }
  0xb0   : > { %v698_v48 = vpop.eup %697 }
  0xb1   : > { %709 = vtanh.f32 %v394_v44  ;;  %v700_v50 = vpop.eup %699  ;;  %464 = vmatpush.msrb.mxu0 %v698_v48 }
  0xb2   : > { %711 = vtanh.f32 %v423_v45  ;;  %v702_v52 = vpop.eup %701  ;;  %484 = vmatpush.msrb.mxu1 %v700_v50 }
  0xb3   : > { %713 = vtanh.f32 %v391_v43  ;;  %v704_v54 = vpop.eup %703  ;;  %465 = vmatpush.msrb.mxu0 %v702_v52 }
  0xb4   : > { %715 = vtanh.f32 %v420_v47  ;;  %v706_v56 = vpop.eup %705  ;;  %485 = vmatpush.msrb.mxu1 %v704_v54 }
  0xb5   : > { %717 = vtanh.f32 %v388_v49  ;;  %v708_v57 = vpop.eup %707  ;;  %466 = vmatpush.msrb.mxu0 %v706_v56 }
  0xb6   : > { %719 = vtanh.f32 %v417_v51  ;;  %486 = vmatpush.msrb.mxu1 %v708_v57 }
  0xb7   : > { %v710_v58 = vpop.eup %709  ;;  %721 = vtanh.f32 %v385_v53  ;;  %467 = vmatpush.msrb.mxu0 %v694_v42 }
  0xb8   : > { %v712_v59 = vpop.eup %711  ;;  %723 = vtanh.f32 %v414_v55  ;;  %504 = vmatpush.msrb.mxu2 %v710_v58  ;;  %487 = vmatpush.msrb.mxu1 %v696_v46 }
  0xb9   : > { %v714_v60 = vpop.eup %713  ;;  %524 = vmatpush.msrb.mxu3 %v712_v59  ;;  %658 = vmatmul.msk.f32.vlgmr.msrb.gmra.mxu1 %vm448_vm1, %v441_v61 }
  0xba   : > { %v716_v62 = vpop.eup %715  ;;  %505 = vmatpush.msrb.mxu2 %v714_v60  ;;  %657 = vmatmul.msk.f32.vlgmr.msrb.gmra.mxu0 %vm448_vm1, %v441_v61 }
  0xbb   : > { %v718_v63 = vpop.eup %717  ;;  %525 = vmatpush.msrb.mxu3 %v716_v62 }
  0xbc   : > { %v720_v0 = vpop.eup %719  ;;  %506 = vmatpush.msrb.mxu2 %v718_v63 }
  0xbd   : > { %v722_v1 = vpop.eup %721  ;;  %526 = vmatpush.msrb.mxu3 %v720_v0 }
  0xbe   : > { %v724_v2 = vpop.eup %723  ;;  %507 = vmatpush.msrb.mxu2 %v722_v1 }
  0xbf   : > { %527 = vmatpush.msrb.mxu3 %v724_v2  ;;  %659 = vmatmul.msk.f32.vlgmr.msrb.gmra.mxu2 %vm448_vm1, %v441_v61 }
  0xc0   : > { %660 = vmatmul.msk.f32.vlgmr.msrb.gmra.mxu3 %vm448_vm1, %v441_v61 }
 0x136   : > { %v489_v4 = vpop.f32.mrf.mxu1 }
 0x137   : > { %v490_v5 = vadd.f32 %v489_v4, %v446_v3  ;;  %v469_v6 = vpop.f32.mrf.mxu0 }
 0x138   : > { %v470_v7 = vadd.f32 %v469_v6, %v446_v3 }
 0x139   : > { %v536_v8 = vrot.slane %v490_v5, 4 }
 0x13b   : > { %v539_v9 = vsel %vm538_vm2, %v470_v7, %v536_v8 }
 0x13c   : > { %543 = vst [vmem:[%s262_s28] sm:$0x77] %v539_v9 }
 0x142   : > { %v509_v11 = vpop.f32.mrf.mxu2 }
 0x143   : > { %v529_v10 = vpop.f32.mrf.mxu3  ;;  %v510_v14 = vadd.f32 %v509_v11, %v446_v3 }
 0x144   : > { %v530_v12 = vadd.f32 %v529_v10, %v446_v3 }
 0x146   : > { %v537_v13 = vrot.slane %v530_v12, 4 }
 0x148   : > { %v540_v15 = vsel %vm538_vm2, %v510_v14, %v537_v13 }
 0x149   : > { %544 = vst [vmem:[%s262_s28 + $0x8] sm:$0x77] %v540_v15 }
 0x14a PF: > { %s15_s20 = sadd.s32 1, %s747_s20   ;;  %s869_s18 = smov %s743_s19 }
 0x14b   : > { %p12_p5 = scmp.ge.s32.totalorder %s15_s20, 4   ;;  %s870_s19 = smov %s872_s21 }
 0x14d   :  { %14 = sbr.rel (!%p12_p5) target bundleno = 2 (0x2), region = 70 }

</bundles_post_ra>
